<compile_context>
chip_gen: v7x
topology: tpu7x:2x2x1
jax: 0.10.0
libtpu: 0.0.40
codegen_flags: <defaults>
</compile_context>

<pallas_src>
import jax
import jax.numpy as jnp
from jax.experimental import pallas as pl
from jax.experimental.pallas import tpu as pltpu


def _round_up(n, m):
    return ((n + m - 1) // m) * m


def lstm_model_forward(x, params, *, t_chunk=None, matmul_dtype=jnp.bfloat16):
    """x: (B, T, I) float32 -> (B, O) float32.  Single-layer LSTM + Linear on h_T."""
    B, T, I = x.shape
    H = params["w_hh"].shape[1]
    O = params["w_fc"].shape[0]

    LANE, SUB = 128, 8
    Hp = _round_up(H, LANE)            # per-gate hidden padding -> lane-aligned gate slices
    Op = _round_up(O, LANE)            # lane-dense final store
    Bp = _round_up(B, SUB)             # sublane-aligned batch
    if Bp > LANE:
        Bp = _round_up(B, LANE)
    bt = min(Bp, LANE)                 # batch tile (parallel grid axis)
    nb = Bp // bt

    f32 = jnp.float32
    op_bytes = jnp.dtype(matmul_dtype).itemsize

    # ---- per-generation VMEM budget -> chunk size Tc and explicit vmem limit ----------
    try:
        vmem_cap = int(getattr(pltpu.get_tpu_info(), "vmem_capacity_bytes"))
    except Exception:
        vmem_cap = 64 << 20            # conservative fallback (v7x per-TC VMEM)
    vmem_budget = (vmem_cap * 3) // 4

    def _vmem_bytes(tc):
        gx = tc * bt * 4 * Hp * 4                                   # hoisted projection (f32)
        xbuf = 2 * tc * bt * I * op_bytes                           # double-buffered x chunk
        wts = 2 * ((I * 4 * Hp + Hp * 4 * Hp + Hp * Op) * op_bytes
                   + (4 * Hp + Op) * 4)                             # double-buffered weights
        state = 2 * bt * Hp * 4                                     # h, c scratch
        outb = 2 * bt * Op * 4                                      # resident output
        return gx + xbuf + wts + state + outb

    Tc = t_chunk if t_chunk is not None else min(T, 32)
    while Tc > 1 and _vmem_bytes(Tc) > vmem_budget:
        Tc = max(1, Tc // 2)
    nt = pl.cdiv(T, Tc)
    Tp = nt * Tc
    vmem_limit = int(min(vmem_cap, max(_vmem_bytes(Tc) + (8 << 20), 32 << 20)))

    # ---- glue: gate reorder [i,f,g,o]->[i,f,o,g], transpose, zero-pad ------------------
    perm = [0, 1, 3, 2]   # sigmoid gates (i, f, o) contiguous; tanh gate (g) last
    w_ih_p = jnp.pad(params["w_ih"].T.reshape(I, 4, H)[:, perm, :],
                     ((0, 0), (0, 0), (0, Hp - H))).reshape(I, 4 * Hp)
    w_hh_p = jnp.pad(params["w_hh"].T.reshape(H, 4, H)[:, perm, :],
                     ((0, Hp - H), (0, 0), (0, Hp - H))).reshape(Hp, 4 * Hp)
    b_p = jnp.pad((params["b_ih"] + params["b_hh"]).reshape(4, H)[perm, :],
                  ((0, 0), (0, Hp - H))).reshape(1, 4 * Hp).astype(f32)
    w_fc_p = jnp.pad(params["w_fc"].T, ((0, Hp - H), (0, Op - O)))
    b_fc_p = jnp.pad(params["b_fc"], (0, Op - O)).reshape(1, Op).astype(f32)

    # (B, T, I) -> (nt, nb, Tc*bt, I): time-major chunks, batch tiles, flat (Tc*bt) rows
    # so each grid step DMAs one 2-D lane-contiguous tile and no in-kernel reshape runs.
    x_tm = jnp.pad(jnp.transpose(x, (1, 0, 2)),
                   ((0, Tp - T), (0, Bp - B), (0, 0)))              # (Tp, Bp, I)
    x_flat = (x_tm.reshape(nt, Tc, nb, bt, I)
                   .transpose(0, 2, 1, 3, 4)
                   .reshape(nt, nb, Tc * bt, I))

    # Matmul operands in matmul_dtype (bf16 default); accumulation/state stay f32.
    x_flat = x_flat.astype(matmul_dtype)
    w_ih_p = w_ih_p.astype(matmul_dtype)
    w_hh_p = w_hh_p.astype(matmul_dtype)
    w_fc_p = w_fc_p.astype(matmul_dtype)

    needs_mask = (Tp != T)             # ragged T: padded steps must not update state
    step_unroll = min(Tc, 8)

    def kernel(x_ref, w_ih_ref, w_hh_ref, b_ref, w_fc_ref, b_fc_ref,
               out_ref, gx_ref, h_ref, c_ref):
        ti = pl.program_id(1)          # time-chunk index (sequential axis)

        @pl.when(ti == 0)
        def _():
            h_ref[...] = jnp.zeros_like(h_ref)
            c_ref[...] = jnp.zeros_like(c_ref)

        # Hoisted input projection for the whole chunk: one big MXU matmul + bias.
        gx_ref[...] = (jnp.dot(x_ref[...], w_ih_ref[...], preferred_element_type=f32)
                       + b_ref[...])                               # (Tc*bt, 4Hp)

        def make_step(masked):
            def step(s, carry):
                h, c = carry
                row = pl.multiple_of(s * bt, bt)
                g_x = gx_ref[pl.ds(row, bt), :]                    # (bt, 4Hp)
                gates = g_x + jnp.dot(h.astype(w_hh_ref.dtype), w_hh_ref[...],
                                      preferred_element_type=f32)
                sig = jax.nn.sigmoid(gates[:, :3 * Hp])            # one EUP pass: i, f, o
                i_g = sig[:, 0 * Hp:1 * Hp]
                f_g = sig[:, 1 * Hp:2 * Hp]
                o_g = sig[:, 2 * Hp:3 * Hp]
                g_g = jnp.tanh(gates[:, 3 * Hp:4 * Hp])
                c_new = f_g * c + i_g * g_g
                h_new = o_g * jnp.tanh(c_new)
                if masked:
                    valid = (ti * Tc + s) < T
                    h_new = jnp.where(valid, h_new, h)
                    c_new = jnp.where(valid, c_new, c)
                return h_new, c_new
            return step

        def run_chunk(carry, masked):
            return jax.lax.fori_loop(0, Tc, make_step(masked), carry,
                                     unroll=step_unroll)

        carry0 = (h_ref[...], c_ref[...])
        if needs_mask:
            # Only the last chunk pays the per-step validity mask.
            h, c = jax.lax.cond(ti == nt - 1,
                                lambda cr: run_chunk(cr, True),
                                lambda cr: run_chunk(cr, False),
                                carry0)
        else:
            h, c = run_chunk(carry0, False)

        h_ref[...] = h
        c_ref[...] = c

        @pl.when(ti == nt - 1)
        def _():
            out_ref[...] = (jnp.dot(h.astype(w_fc_ref.dtype), w_fc_ref[...],
                                    preferred_element_type=f32)
                            + b_fc_ref[...]).astype(out_ref.dtype)

    out_p = pl.pallas_call(
        kernel,
        out_shape=jax.ShapeDtypeStruct((Bp, Op), f32),
        grid_spec=pltpu.PrefetchScalarGridSpec(
            num_scalar_prefetch=0,
            grid=(nb, nt),
            in_specs=[
                pl.BlockSpec((None, None, Tc * bt, I),
                             lambda bi, ti: (ti, bi, 0, 0)),             # x chunk (2-D tile)
                pl.BlockSpec((I, 4 * Hp), lambda bi, ti: (0, 0)),        # W_ih^T (padded)
                pl.BlockSpec((Hp, 4 * Hp), lambda bi, ti: (0, 0)),       # W_hh^T (padded)
                pl.BlockSpec((1, 4 * Hp), lambda bi, ti: (0, 0)),        # b_ih + b_hh
                pl.BlockSpec((Hp, Op), lambda bi, ti: (0, 0)),           # W_fc^T (padded)
                pl.BlockSpec((1, Op), lambda bi, ti: (0, 0)),            # b_fc
            ],
            out_specs=pl.BlockSpec((bt, Op), lambda bi, ti: (bi, 0)),    # resident over time
            scratch_shapes=[
                pltpu.VMEM((Tc * bt, 4 * Hp), f32),   # hoisted x-projection for the chunk
                pltpu.VMEM((bt, Hp), f32),            # h_t
                pltpu.VMEM((bt, Hp), f32),            # c_t
            ],
        ),
        compiler_params=pltpu.CompilerParams(
            dimension_semantics=("parallel", "arbitrary"),   # batch tiles ∥, time sequential
            vmem_limit_bytes=vmem_limit),
    )(x_flat, w_ih_p, w_hh_p, b_p, w_fc_p, b_fc_p)

    return out_p[:B, :O]


def init_params(key, input_size, hidden_size, output_size):
    """Deterministic synthetic params (PyTorch-style uniform(-1/sqrt(H), 1/sqrt(H)))."""
    ks = jax.random.split(key, 6)
    s = 1.0 / jnp.sqrt(hidden_size)
    u = lambda k, shape: jax.random.uniform(k, shape, jnp.float32, -s, s)
    return {
        "w_ih": u(ks[0], (4 * hidden_size, input_size)),
        "w_hh": u(ks[1], (4 * hidden_size, hidden_size)),
        "b_ih": u(ks[2], (4 * hidden_size,)),
        "b_hh": u(ks[3], (4 * hidden_size,)),
        "w_fc": u(ks[4], (output_size, hidden_size)),
        "b_fc": u(ks[5], (output_size,)),
    }


def lstm_model_reference(x, params):
    """Pure-JAX reference matching torch.nn.LSTM(batch_first=True) + Linear semantics."""
    B, T, I = x.shape
    H = params["w_hh"].shape[1]

    def step(carry, x_t):
        h, c = carry
        gates = (x_t @ params["w_ih"].T + params["b_ih"]
                 + h @ params["w_hh"].T + params["b_hh"])
        i_g, f_g, g_g, o_g = jnp.split(gates, 4, axis=-1)
        c = jax.nn.sigmoid(f_g) * c + jax.nn.sigmoid(i_g) * jnp.tanh(g_g)
        h = jax.nn.sigmoid(o_g) * jnp.tanh(c)
        return (h, c), None

    h0 = jnp.zeros((B, H), jnp.float32)
    c0 = jnp.zeros((B, H), jnp.float32)
    (hT, _), _ = jax.lax.scan(step, (h0, c0), jnp.transpose(x, (1, 0, 2)))
    return hT @ params["w_fc"].T + params["b_fc"]


if __name__ == "__main__":
    # Shapes consistent with the module: x (batch, seq, input_size), hidden_size=50.
    B, T, I, H, O = 2, 8, 16, 50, 4

    key = jax.random.PRNGKey(0)
    kx, kp = jax.random.split(key)
    x = jax.random.normal(kx, (B, T, I), dtype=jnp.float32)
    params = init_params(kp, I, H, O)

    ref = lstm_model_reference(x, params)

    # Exact-parity path (f32 matmul operands).
    out_f32 = jax.block_until_ready(lstm_model_forward(x, params, matmul_dtype=jnp.float32))
    assert out_f32.shape == (B, O)
    assert jnp.allclose(out_f32, ref, atol=1e-4, rtol=1e-4), "f32 Pallas output mismatch"

    # Default fast path (bf16 matmul operands, f32 accumulation/state).
    out = jax.block_until_ready(lstm_model_forward(x, params))
    assert out.shape == (B, O)
    assert jnp.allclose(out, ref, atol=3e-2, rtol=3e-2), "bf16 Pallas output mismatch"

    print("KERNEL_OK")
</pallas_src>

<mosaic_0001>
module attributes {stable_mosaic.version = 11 : i64} {
  func.func @kernel(%arg0: i32, %arg1: i32, %arg2: memref<1x1x64x16xf32, #tpu.memory_space<vmem>>, %arg3: memref<16x512xf32, #tpu.memory_space<vmem>>, %arg4: memref<128x512xf32, #tpu.memory_space<vmem>>, %arg5: memref<1x512xf32, #tpu.memory_space<vmem>>, %arg6: memref<128x128xf32, #tpu.memory_space<vmem>>, %arg7: memref<1x128xf32, #tpu.memory_space<vmem>>, %arg8: memref<8x128xf32, #tpu.memory_space<vmem>>, %arg9: memref<64x512xf32, #tpu.memory_space<vmem>>, %arg10: memref<8x128xf32, #tpu.memory_space<vmem>>, %arg11: memref<8x128xf32, #tpu.memory_space<vmem>>) attributes {dimension_semantics = [#tpu.dimension_semantics<parallel>, #tpu.dimension_semantics<arbitrary>], iteration_bounds = array<i64: 1, 1>, scalar_prefetch = 0 : i64, scratch_operands = 3 : i64, tpu.core_type = #tpu.core_type<tc>, window_params = [{transform_indices = @transform_0, window_bounds = array<i64: 1, 1, 64, 16>}, {pipeline_mode = #tpu.pipeline_mode<synchronous>, transform_indices = @transform_1, window_bounds = array<i64: 16, 512>}, {pipeline_mode = #tpu.pipeline_mode<synchronous>, transform_indices = @transform_2, window_bounds = array<i64: 128, 512>}, {pipeline_mode = #tpu.pipeline_mode<synchronous>, transform_indices = @transform_3, window_bounds = array<i64: 1, 512>}, {pipeline_mode = #tpu.pipeline_mode<synchronous>, transform_indices = @transform_4, window_bounds = array<i64: 128, 128>}, {pipeline_mode = #tpu.pipeline_mode<synchronous>, transform_indices = @transform_5, window_bounds = array<i64: 1, 128>}, {transform_indices = @transform_6, window_bounds = array<i64: 8, 128>}]} {
    %c0_i32 = arith.constant 0 : i32
    %0 = arith.cmpi eq, %arg1, %c0_i32 : i32
    %1 = arith.extui %0 : i1 to i32
    %c0_i32_0 = arith.constant 0 : i32
    %2 = arith.cmpi ne, %1, %c0_i32_0 : i32
    scf.if %2 {
      %cst_69 = arith.constant 0.000000e+00 : f32
      %202 = vector.broadcast %cst_69 : f32 to vector<8x128xf32>
      %c0_70 = arith.constant 0 : index
      %c0_71 = arith.constant 0 : index
      %203 = vector.load %arg10[%c0_70, %c0_71] : memref<8x128xf32, #tpu.memory_space<vmem>>, vector<8x128xf32>
      tpu.vector_store %arg10[%c0_70, %c0_71], %202 {strides = array<i32>} : memref<8x128xf32, #tpu.memory_space<vmem>>, vector<8x128xf32>,
      %cst_72 = arith.constant 0.000000e+00 : f32
      %204 = vector.broadcast %cst_72 : f32 to vector<8x128xf32>
      %c0_73 = arith.constant 0 : index
      %c0_74 = arith.constant 0 : index
      %205 = vector.load %arg11[%c0_73, %c0_74] : memref<8x128xf32, #tpu.memory_space<vmem>>, vector<8x128xf32>
      tpu.vector_store %arg11[%c0_73, %c0_74], %204 {strides = array<i32>} : memref<8x128xf32, #tpu.memory_space<vmem>>, vector<8x128xf32>,
    } else {
    }
    %c0 = arith.constant 0 : index
    %c0_1 = arith.constant 0 : index
    %c0_2 = arith.constant 0 : index
    %c0_3 = arith.constant 0 : index
    %3 = vector.load %arg2[%c0, %c0_1, %c0_2, %c0_3] : memref<1x1x64x16xf32, #tpu.memory_space<vmem>>, vector<1x1x64x16xf32>
    %4 = vector.shape_cast %3 : vector<1x1x64x16xf32> to vector<64x16xf32>
    %c0_4 = arith.constant 0 : index
    %c0_5 = arith.constant 0 : index
    %5 = vector.load %arg3[%c0_4, %c0_5] : memref<16x512xf32, #tpu.memory_space<vmem>>, vector<16x512xf32>
    %cst = arith.constant dense<0.000000e+00> : vector<64x512xf32>
    %6 = tpu.matmul %4, %5, %cst {dimension_numbers = #tpu.dot_dimension_numbers<[1], [0], [0], [1], [0, 0, 1, 1], [], []>} : vector<64x16xf32>, vector<16x512xf32>, vector<64x512xf32> -> vector<64x512xf32>
    %c0_6 = arith.constant 0 : index
    %c0_7 = arith.constant 0 : index
    %7 = vector.load %arg5[%c0_6, %c0_7] : memref<1x512xf32, #tpu.memory_space<vmem>>, vector<1x512xf32>
    %8 = vector.broadcast %7 : vector<1x512xf32> to vector<64x512xf32>
    %9 = arith.addf %6, %8 : vector<64x512xf32>
    %c0_8 = arith.constant 0 : index
    %c0_9 = arith.constant 0 : index
    %10 = vector.load %arg9[%c0_8, %c0_9] : memref<64x512xf32, #tpu.memory_space<vmem>>, vector<64x512xf32>
    tpu.vector_store %arg9[%c0_8, %c0_9], %9 {strides = array<i32>} : memref<64x512xf32, #tpu.memory_space<vmem>>, vector<64x512xf32>,
    %c0_10 = arith.constant 0 : index
    %c0_11 = arith.constant 0 : index
    %11 = vector.load %arg10[%c0_10, %c0_11] : memref<8x128xf32, #tpu.memory_space<vmem>>, vector<8x128xf32>
    %c0_12 = arith.constant 0 : index
    %c0_13 = arith.constant 0 : index
    %12 = vector.load %arg11[%c0_12, %c0_13] : memref<8x128xf32, #tpu.memory_space<vmem>>, vector<8x128xf32>
    %c0_i32_14 = arith.constant 0 : i32
    %c8_i32 = arith.constant 8 : i32
    %13 = arith.muli %c0_i32_14, %c8_i32 : i32
    %14 = tpu.assume_multiple %13, 8 : i32
    %15 = arith.index_cast %14 : i32 to index
    %c0_15 = arith.constant 0 : index
    %16 = vector.load %arg9[%15, %c0_15] : memref<64x512xf32, #tpu.memory_space<vmem>>, vector<8x512xf32>
    %c0_16 = arith.constant 0 : index
    %c0_17 = arith.constant 0 : index
    %17 = vector.load %arg4[%c0_16, %c0_17] : memref<128x512xf32, #tpu.memory_space<vmem>>, vector<128x512xf32>
    %cst_18 = arith.constant dense<0.000000e+00> : vector<8x512xf32>
    %18 = tpu.matmul %11, %17, %cst_18 {dimension_numbers = #tpu.dot_dimension_numbers<[1], [0], [0], [1], [0, 0, 1, 1], [], []>} : vector<8x128xf32>, vector<128x512xf32>, vector<8x512xf32> -> vector<8x512xf32>
    %19 = arith.addf %16, %18 : vector<8x512xf32>
    %20 = vector.extract_strided_slice %19 {offsets = [0, 0], sizes = [8, 384], strides = [1, 1]} : vector<8x512xf32> to vector<8x384xf32>
    %21 = arith.negf %20 : vector<8x384xf32>
    %22 = math.exp %21 : vector<8x384xf32>
    %cst_19 = arith.constant 1.000000e+00 : f32
    %23 = vector.broadcast %cst_19 : f32 to vector<8x384xf32>
    %24 = arith.addf %23, %22 : vector<8x384xf32>
    %25 = arith.divf %23, %24 : vector<8x384xf32>
    %26 = vector.extract_strided_slice %25 {offsets = [0, 0], sizes = [8, 128], strides = [1, 1]} : vector<8x384xf32> to vector<8x128xf32>
    %27 = vector.extract_strided_slice %25 {offsets = [0, 128], sizes = [8, 128], strides = [1, 1]} : vector<8x384xf32> to vector<8x128xf32>
    %28 = vector.extract_strided_slice %25 {offsets = [0, 256], sizes = [8, 128], strides = [1, 1]} : vector<8x384xf32> to vector<8x128xf32>
    %29 = vector.extract_strided_slice %19 {offsets = [0, 384], sizes = [8, 128], strides = [1, 1]} : vector<8x512xf32> to vector<8x128xf32>
    %30 = math.tanh %29 : vector<8x128xf32>
    %31 = arith.mulf %27, %12 : vector<8x128xf32>
    %32 = arith.mulf %26, %30 : vector<8x128xf32>
    %33 = arith.addf %31, %32 : vector<8x128xf32>
    %34 = math.tanh %33 : vector<8x128xf32>
    %35 = arith.mulf %28, %34 : vector<8x128xf32>
    %c1_i32 = arith.constant 1 : i32
    %c8_i32_20 = arith.constant 8 : i32
    %36 = arith.muli %c1_i32, %c8_i32_20 : i32
    %37 = tpu.assume_multiple %36, 8 : i32
    %38 = arith.index_cast %37 : i32 to index
    %c0_21 = arith.constant 0 : index
    %39 = vector.load %arg9[%38, %c0_21] : memref<64x512xf32, #tpu.memory_space<vmem>>, vector<8x512xf32>
    %c0_22 = arith.constant 0 : index
    %c0_23 = arith.constant 0 : index
    %40 = vector.load %arg4[%c0_22, %c0_23] : memref<128x512xf32, #tpu.memory_space<vmem>>, vector<128x512xf32>
    %cst_24 = arith.constant dense<0.000000e+00> : vector<8x512xf32>
    %41 = tpu.matmul %35, %40, %cst_24 {dimension_numbers = #tpu.dot_dimension_numbers<[1], [0], [0], [1], [0, 0, 1, 1], [], []>} : vector<8x128xf32>, vector<128x512xf32>, vector<8x512xf32> -> vector<8x512xf32>
    %42 = arith.addf %39, %41 : vector<8x512xf32>
    %43 = vector.extract_strided_slice %42 {offsets = [0, 0], sizes = [8, 384], strides = [1, 1]} : vector<8x512xf32> to vector<8x384xf32>
    %44 = arith.negf %43 : vector<8x384xf32>
    %45 = math.exp %44 : vector<8x384xf32>
    %cst_25 = arith.constant 1.000000e+00 : f32
    %46 = vector.broadcast %cst_25 : f32 to vector<8x384xf32>
    %47 = arith.addf %46, %45 : vector<8x384xf32>
    %48 = arith.divf %46, %47 : vector<8x384xf32>
    %49 = vector.extract_strided_slice %48 {offsets = [0, 0], sizes = [8, 128], strides = [1, 1]} : vector<8x384xf32> to vector<8x128xf32>
    %50 = vector.extract_strided_slice %48 {offsets = [0, 128], sizes = [8, 128], strides = [1, 1]} : vector<8x384xf32> to vector<8x128xf32>
    %51 = vector.extract_strided_slice %48 {offsets = [0, 256], sizes = [8, 128], strides = [1, 1]} : vector<8x384xf32> to vector<8x128xf32>
    %52 = vector.extract_strided_slice %42 {offsets = [0, 384], sizes = [8, 128], strides = [1, 1]} : vector<8x512xf32> to vector<8x128xf32>
    %53 = math.tanh %52 : vector<8x128xf32>
    %54 = arith.mulf %50, %33 : vector<8x128xf32>
    %55 = arith.mulf %49, %53 : vector<8x128xf32>
    %56 = arith.addf %54, %55 : vector<8x128xf32>
    %57 = math.tanh %56 : vector<8x128xf32>
    %58 = arith.mulf %51, %57 : vector<8x128xf32>
    %c2_i32 = arith.constant 2 : i32
    %c8_i32_26 = arith.constant 8 : i32
    %59 = arith.muli %c2_i32, %c8_i32_26 : i32
    %60 = tpu.assume_multiple %59, 8 : i32
    %61 = arith.index_cast %60 : i32 to index
    %c0_27 = arith.constant 0 : index
    %62 = vector.load %arg9[%61, %c0_27] : memref<64x512xf32, #tpu.memory_space<vmem>>, vector<8x512xf32>
    %c0_28 = arith.constant 0 : index
    %c0_29 = arith.constant 0 : index
    %63 = vector.load %arg4[%c0_28, %c0_29] : memref<128x512xf32, #tpu.memory_space<vmem>>, vector<128x512xf32>
    %cst_30 = arith.constant dense<0.000000e+00> : vector<8x512xf32>
    %64 = tpu.matmul %58, %63, %cst_30 {dimension_numbers = #tpu.dot_dimension_numbers<[1], [0], [0], [1], [0, 0, 1, 1], [], []>} : vector<8x128xf32>, vector<128x512xf32>, vector<8x512xf32> -> vector<8x512xf32>
    %65 = arith.addf %62, %64 : vector<8x512xf32>
    %66 = vector.extract_strided_slice %65 {offsets = [0, 0], sizes = [8, 384], strides = [1, 1]} : vector<8x512xf32> to vector<8x384xf32>
    %67 = arith.negf %66 : vector<8x384xf32>
    %68 = math.exp %67 : vector<8x384xf32>
    %cst_31 = arith.constant 1.000000e+00 : f32
    %69 = vector.broadcast %cst_31 : f32 to vector<8x384xf32>
    %70 = arith.addf %69, %68 : vector<8x384xf32>
    %71 = arith.divf %69, %70 : vector<8x384xf32>
    %72 = vector.extract_strided_slice %71 {offsets = [0, 0], sizes = [8, 128], strides = [1, 1]} : vector<8x384xf32> to vector<8x128xf32>
    %73 = vector.extract_strided_slice %71 {offsets = [0, 128], sizes = [8, 128], strides = [1, 1]} : vector<8x384xf32> to vector<8x128xf32>
    %74 = vector.extract_strided_slice %71 {offsets = [0, 256], sizes = [8, 128], strides = [1, 1]} : vector<8x384xf32> to vector<8x128xf32>
    %75 = vector.extract_strided_slice %65 {offsets = [0, 384], sizes = [8, 128], strides = [1, 1]} : vector<8x512xf32> to vector<8x128xf32>
    %76 = math.tanh %75 : vector<8x128xf32>
    %77 = arith.mulf %73, %56 : vector<8x128xf32>
    %78 = arith.mulf %72, %76 : vector<8x128xf32>
    %79 = arith.addf %77, %78 : vector<8x128xf32>
    %80 = math.tanh %79 : vector<8x128xf32>
    %81 = arith.mulf %74, %80 : vector<8x128xf32>
    %c3_i32 = arith.constant 3 : i32
    %c8_i32_32 = arith.constant 8 : i32
    %82 = arith.muli %c3_i32, %c8_i32_32 : i32
    %83 = tpu.assume_multiple %82, 8 : i32
    %84 = arith.index_cast %83 : i32 to index
    %c0_33 = arith.constant 0 : index
    %85 = vector.load %arg9[%84, %c0_33] : memref<64x512xf32, #tpu.memory_space<vmem>>, vector<8x512xf32>
    %c0_34 = arith.constant 0 : index
    %c0_35 = arith.constant 0 : index
    %86 = vector.load %arg4[%c0_34, %c0_35] : memref<128x512xf32, #tpu.memory_space<vmem>>, vector<128x512xf32>
    %cst_36 = arith.constant dense<0.000000e+00> : vector<8x512xf32>
    %87 = tpu.matmul %81, %86, %cst_36 {dimension_numbers = #tpu.dot_dimension_numbers<[1], [0], [0], [1], [0, 0, 1, 1], [], []>} : vector<8x128xf32>, vector<128x512xf32>, vector<8x512xf32> -> vector<8x512xf32>
    %88 = arith.addf %85, %87 : vector<8x512xf32>
    %89 = vector.extract_strided_slice %88 {offsets = [0, 0], sizes = [8, 384], strides = [1, 1]} : vector<8x512xf32> to vector<8x384xf32>
    %90 = arith.negf %89 : vector<8x384xf32>
    %91 = math.exp %90 : vector<8x384xf32>
    %cst_37 = arith.constant 1.000000e+00 : f32
    %92 = vector.broadcast %cst_37 : f32 to vector<8x384xf32>
    %93 = arith.addf %92, %91 : vector<8x384xf32>
    %94 = arith.divf %92, %93 : vector<8x384xf32>
    %95 = vector.extract_strided_slice %94 {offsets = [0, 0], sizes = [8, 128], strides = [1, 1]} : vector<8x384xf32> to vector<8x128xf32>
    %96 = vector.extract_strided_slice %94 {offsets = [0, 128], sizes = [8, 128], strides = [1, 1]} : vector<8x384xf32> to vector<8x128xf32>
    %97 = vector.extract_strided_slice %94 {offsets = [0, 256], sizes = [8, 128], strides = [1, 1]} : vector<8x384xf32> to vector<8x128xf32>
    %98 = vector.extract_strided_slice %88 {offsets = [0, 384], sizes = [8, 128], strides = [1, 1]} : vector<8x512xf32> to vector<8x128xf32>
    %99 = math.tanh %98 : vector<8x128xf32>
    %100 = arith.mulf %96, %79 : vector<8x128xf32>
    %101 = arith.mulf %95, %99 : vector<8x128xf32>
    %102 = arith.addf %100, %101 : vector<8x128xf32>
    %103 = math.tanh %102 : vector<8x128xf32>
    %104 = arith.mulf %97, %103 : vector<8x128xf32>
    %c4_i32 = arith.constant 4 : i32
    %c8_i32_38 = arith.constant 8 : i32
    %105 = arith.muli %c4_i32, %c8_i32_38 : i32
    %106 = tpu.assume_multiple %105, 8 : i32
    %107 = arith.index_cast %106 : i32 to index
    %c0_39 = arith.constant 0 : index
    %108 = vector.load %arg9[%107, %c0_39] : memref<64x512xf32, #tpu.memory_space<vmem>>, vector<8x512xf32>
    %c0_40 = arith.constant 0 : index
    %c0_41 = arith.constant 0 : index
    %109 = vector.load %arg4[%c0_40, %c0_41] : memref<128x512xf32, #tpu.memory_space<vmem>>, vector<128x512xf32>
    %cst_42 = arith.constant dense<0.000000e+00> : vector<8x512xf32>
    %110 = tpu.matmul %104, %109, %cst_42 {dimension_numbers = #tpu.dot_dimension_numbers<[1], [0], [0], [1], [0, 0, 1, 1], [], []>} : vector<8x128xf32>, vector<128x512xf32>, vector<8x512xf32> -> vector<8x512xf32>
    %111 = arith.addf %108, %110 : vector<8x512xf32>
    %112 = vector.extract_strided_slice %111 {offsets = [0, 0], sizes = [8, 384], strides = [1, 1]} : vector<8x512xf32> to vector<8x384xf32>
    %113 = arith.negf %112 : vector<8x384xf32>
    %114 = math.exp %113 : vector<8x384xf32>
    %cst_43 = arith.constant 1.000000e+00 : f32
    %115 = vector.broadcast %cst_43 : f32 to vector<8x384xf32>
    %116 = arith.addf %115, %114 : vector<8x384xf32>
    %117 = arith.divf %115, %116 : vector<8x384xf32>
    %118 = vector.extract_strided_slice %117 {offsets = [0, 0], sizes = [8, 128], strides = [1, 1]} : vector<8x384xf32> to vector<8x128xf32>
    %119 = vector.extract_strided_slice %117 {offsets = [0, 128], sizes = [8, 128], strides = [1, 1]} : vector<8x384xf32> to vector<8x128xf32>
    %120 = vector.extract_strided_slice %117 {offsets = [0, 256], sizes = [8, 128], strides = [1, 1]} : vector<8x384xf32> to vector<8x128xf32>
    %121 = vector.extract_strided_slice %111 {offsets = [0, 384], sizes = [8, 128], strides = [1, 1]} : vector<8x512xf32> to vector<8x128xf32>
    %122 = math.tanh %121 : vector<8x128xf32>
    %123 = arith.mulf %119, %102 : vector<8x128xf32>
    %124 = arith.mulf %118, %122 : vector<8x128xf32>
    %125 = arith.addf %123, %124 : vector<8x128xf32>
    %126 = math.tanh %125 : vector<8x128xf32>
    %127 = arith.mulf %120, %126 : vector<8x128xf32>
    %c5_i32 = arith.constant 5 : i32
    %c8_i32_44 = arith.constant 8 : i32
    %128 = arith.muli %c5_i32, %c8_i32_44 : i32
    %129 = tpu.assume_multiple %128, 8 : i32
    %130 = arith.index_cast %129 : i32 to index
    %c0_45 = arith.constant 0 : index
    %131 = vector.load %arg9[%130, %c0_45] : memref<64x512xf32, #tpu.memory_space<vmem>>, vector<8x512xf32>
    %c0_46 = arith.constant 0 : index
    %c0_47 = arith.constant 0 : index
    %132 = vector.load %arg4[%c0_46, %c0_47] : memref<128x512xf32, #tpu.memory_space<vmem>>, vector<128x512xf32>
    %cst_48 = arith.constant dense<0.000000e+00> : vector<8x512xf32>
    %133 = tpu.matmul %127, %132, %cst_48 {dimension_numbers = #tpu.dot_dimension_numbers<[1], [0], [0], [1], [0, 0, 1, 1], [], []>} : vector<8x128xf32>, vector<128x512xf32>, vector<8x512xf32> -> vector<8x512xf32>
    %134 = arith.addf %131, %133 : vector<8x512xf32>
    %135 = vector.extract_strided_slice %134 {offsets = [0, 0], sizes = [8, 384], strides = [1, 1]} : vector<8x512xf32> to vector<8x384xf32>
    %136 = arith.negf %135 : vector<8x384xf32>
    %137 = math.exp %136 : vector<8x384xf32>
    %cst_49 = arith.constant 1.000000e+00 : f32
    %138 = vector.broadcast %cst_49 : f32 to vector<8x384xf32>
    %139 = arith.addf %138, %137 : vector<8x384xf32>
    %140 = arith.divf %138, %139 : vector<8x384xf32>
    %141 = vector.extract_strided_slice %140 {offsets = [0, 0], sizes = [8, 128], strides = [1, 1]} : vector<8x384xf32> to vector<8x128xf32>
    %142 = vector.extract_strided_slice %140 {offsets = [0, 128], sizes = [8, 128], strides = [1, 1]} : vector<8x384xf32> to vector<8x128xf32>
    %143 = vector.extract_strided_slice %140 {offsets = [0, 256], sizes = [8, 128], strides = [1, 1]} : vector<8x384xf32> to vector<8x128xf32>
    %144 = vector.extract_strided_slice %134 {offsets = [0, 384], sizes = [8, 128], strides = [1, 1]} : vector<8x512xf32> to vector<8x128xf32>
    %145 = math.tanh %144 : vector<8x128xf32>
    %146 = arith.mulf %142, %125 : vector<8x128xf32>
    %147 = arith.mulf %141, %145 : vector<8x128xf32>
    %148 = arith.addf %146, %147 : vector<8x128xf32>
    %149 = math.tanh %148 : vector<8x128xf32>
    %150 = arith.mulf %143, %149 : vector<8x128xf32>
    %c6_i32 = arith.constant 6 : i32
    %c8_i32_50 = arith.constant 8 : i32
    %151 = arith.muli %c6_i32, %c8_i32_50 : i32
    %152 = tpu.assume_multiple %151, 8 : i32
    %153 = arith.index_cast %152 : i32 to index
    %c0_51 = arith.constant 0 : index
    %154 = vector.load %arg9[%153, %c0_51] : memref<64x512xf32, #tpu.memory_space<vmem>>, vector<8x512xf32>
    %c0_52 = arith.constant 0 : index
    %c0_53 = arith.constant 0 : index
    %155 = vector.load %arg4[%c0_52, %c0_53] : memref<128x512xf32, #tpu.memory_space<vmem>>, vector<128x512xf32>
    %cst_54 = arith.constant dense<0.000000e+00> : vector<8x512xf32>
    %156 = tpu.matmul %150, %155, %cst_54 {dimension_numbers = #tpu.dot_dimension_numbers<[1], [0], [0], [1], [0, 0, 1, 1], [], []>} : vector<8x128xf32>, vector<128x512xf32>, vector<8x512xf32> -> vector<8x512xf32>
    %157 = arith.addf %154, %156 : vector<8x512xf32>
    %158 = vector.extract_strided_slice %157 {offsets = [0, 0], sizes = [8, 384], strides = [1, 1]} : vector<8x512xf32> to vector<8x384xf32>
    %159 = arith.negf %158 : vector<8x384xf32>
    %160 = math.exp %159 : vector<8x384xf32>
    %cst_55 = arith.constant 1.000000e+00 : f32
    %161 = vector.broadcast %cst_55 : f32 to vector<8x384xf32>
    %162 = arith.addf %161, %160 : vector<8x384xf32>
    %163 = arith.divf %161, %162 : vector<8x384xf32>
    %164 = vector.extract_strided_slice %163 {offsets = [0, 0], sizes = [8, 128], strides = [1, 1]} : vector<8x384xf32> to vector<8x128xf32>
    %165 = vector.extract_strided_slice %163 {offsets = [0, 128], sizes = [8, 128], strides = [1, 1]} : vector<8x384xf32> to vector<8x128xf32>
    %166 = vector.extract_strided_slice %163 {offsets = [0, 256], sizes = [8, 128], strides = [1, 1]} : vector<8x384xf32> to vector<8x128xf32>
    %167 = vector.extract_strided_slice %157 {offsets = [0, 384], sizes = [8, 128], strides = [1, 1]} : vector<8x512xf32> to vector<8x128xf32>
    %168 = math.tanh %167 : vector<8x128xf32>
    %169 = arith.mulf %165, %148 : vector<8x128xf32>
    %170 = arith.mulf %164, %168 : vector<8x128xf32>
    %171 = arith.addf %169, %170 : vector<8x128xf32>
    %172 = math.tanh %171 : vector<8x128xf32>
    %173 = arith.mulf %166, %172 : vector<8x128xf32>
    %c7_i32 = arith.constant 7 : i32
    %c8_i32_56 = arith.constant 8 : i32
    %174 = arith.muli %c7_i32, %c8_i32_56 : i32
    %175 = tpu.assume_multiple %174, 8 : i32
    %176 = arith.index_cast %175 : i32 to index
    %c0_57 = arith.constant 0 : index
    %177 = vector.load %arg9[%176, %c0_57] : memref<64x512xf32, #tpu.memory_space<vmem>>, vector<8x512xf32>
    %c0_58 = arith.constant 0 : index
    %c0_59 = arith.constant 0 : index
    %178 = vector.load %arg4[%c0_58, %c0_59] : memref<128x512xf32, #tpu.memory_space<vmem>>, vector<128x512xf32>
    %cst_60 = arith.constant dense<0.000000e+00> : vector<8x512xf32>
    %179 = tpu.matmul %173, %178, %cst_60 {dimension_numbers = #tpu.dot_dimension_numbers<[1], [0], [0], [1], [0, 0, 1, 1], [], []>} : vector<8x128xf32>, vector<128x512xf32>, vector<8x512xf32> -> vector<8x512xf32>
    %180 = arith.addf %177, %179 : vector<8x512xf32>
    %181 = vector.extract_strided_slice %180 {offsets = [0, 0], sizes = [8, 384], strides = [1, 1]} : vector<8x512xf32> to vector<8x384xf32>
    %182 = arith.negf %181 : vector<8x384xf32>
    %183 = math.exp %182 : vector<8x384xf32>
    %cst_61 = arith.constant 1.000000e+00 : f32
    %184 = vector.broadcast %cst_61 : f32 to vector<8x384xf32>
    %185 = arith.addf %184, %183 : vector<8x384xf32>
    %186 = arith.divf %184, %185 : vector<8x384xf32>
    %187 = vector.extract_strided_slice %186 {offsets = [0, 0], sizes = [8, 128], strides = [1, 1]} : vector<8x384xf32> to vector<8x128xf32>
    %188 = vector.extract_strided_slice %186 {offsets = [0, 128], sizes = [8, 128], strides = [1, 1]} : vector<8x384xf32> to vector<8x128xf32>
    %189 = vector.extract_strided_slice %186 {offsets = [0, 256], sizes = [8, 128], strides = [1, 1]} : vector<8x384xf32> to vector<8x128xf32>
    %190 = vector.extract_strided_slice %180 {offsets = [0, 384], sizes = [8, 128], strides = [1, 1]} : vector<8x512xf32> to vector<8x128xf32>
    %191 = math.tanh %190 : vector<8x128xf32>
    %192 = arith.mulf %188, %171 : vector<8x128xf32>
    %193 = arith.mulf %187, %191 : vector<8x128xf32>
    %194 = arith.addf %192, %193 : vector<8x128xf32>
    %195 = math.tanh %194 : vector<8x128xf32>
    %196 = arith.mulf %189, %195 : vector<8x128xf32>
    %c8_i32_62 = arith.constant 8 : i32
    %c0_63 = arith.constant 0 : index
    %c0_64 = arith.constant 0 : index
    %197 = vector.load %arg10[%c0_63, %c0_64] : memref<8x128xf32, #tpu.memory_space<vmem>>, vector<8x128xf32>
    tpu.vector_store %arg10[%c0_63, %c0_64], %196 {strides = array<i32>} : memref<8x128xf32, #tpu.memory_space<vmem>>, vector<8x128xf32>,
    %c0_65 = arith.constant 0 : index
    %c0_66 = arith.constant 0 : index
    %198 = vector.load %arg11[%c0_65, %c0_66] : memref<8x128xf32, #tpu.memory_space<vmem>>, vector<8x128xf32>
    tpu.vector_store %arg11[%c0_65, %c0_66], %194 {strides = array<i32>} : memref<8x128xf32, #tpu.memory_space<vmem>>, vector<8x128xf32>,
    %c0_i32_67 = arith.constant 0 : i32
    %199 = arith.cmpi eq, %arg1, %c0_i32_67 : i32
    %200 = arith.extui %199 : i1 to i32
    %c0_i32_68 = arith.constant 0 : i32
    %201 = arith.cmpi ne, %200, %c0_i32_68 : i32
    scf.if %201 {
      %c0_69 = arith.constant 0 : index
      %c0_70 = arith.constant 0 : index
      %202 = vector.load %arg6[%c0_69, %c0_70] : memref<128x128xf32, #tpu.memory_space<vmem>>, vector<128x128xf32>
      %cst_71 = arith.constant dense<0.000000e+00> : vector<8x128xf32>
      %203 = tpu.matmul %196, %202, %cst_71 {dimension_numbers = #tpu.dot_dimension_numbers<[1], [0], [0], [1], [0, 0, 1, 1], [], []>} : vector<8x128xf32>, vector<128x128xf32>, vector<8x128xf32> -> vector<8x128xf32>
      %c0_72 = arith.constant 0 : index
      %c0_73 = arith.constant 0 : index
      %204 = vector.load %arg7[%c0_72, %c0_73] : memref<1x128xf32, #tpu.memory_space<vmem>>, vector<1x128xf32>
      %205 = vector.broadcast %204 : vector<1x128xf32> to vector<8x128xf32>
      %206 = arith.addf %203, %205 : vector<8x128xf32>
      %c0_74 = arith.constant 0 : index
      %c0_75 = arith.constant 0 : index
      %207 = vector.load %arg8[%c0_74, %c0_75] : memref<8x128xf32, #tpu.memory_space<vmem>>, vector<8x128xf32>
      tpu.vector_store %arg8[%c0_74, %c0_75], %206 {strides = array<i32>} : memref<8x128xf32, #tpu.memory_space<vmem>>, vector<8x128xf32>,
    } else {
    }
    return
  }
  func.func @transform_0(%arg0: i32, %arg1: i32) -> (i32, i32, i32, i32) {
    %c0_i32 = arith.constant 0 : i32
    %c0_i32_0 = arith.constant 0 : i32
    %c0_i32_1 = arith.constant 0 : i32
    return %arg1, %arg0, %c0_i32, %c0_i32_0 : i32, i32, i32, i32
  }
  func.func @transform_1(%arg0: i32, %arg1: i32) -> (i32, i32) {
    %c0_i32 = arith.constant 0 : i32
    %c0_i32_0 = arith.constant 0 : i32
    %c0_i32_1 = arith.constant 0 : i32
    return %c0_i32, %c0_i32_0 : i32, i32
  }
  func.func @transform_2(%arg0: i32, %arg1: i32) -> (i32, i32) {
    %c0_i32 = arith.constant 0 : i32
    %c0_i32_0 = arith.constant 0 : i32
    %c0_i32_1 = arith.constant 0 : i32
    return %c0_i32, %c0_i32_0 : i32, i32
  }
  func.func @transform_3(%arg0: i32, %arg1: i32) -> (i32, i32) {
    %c0_i32 = arith.constant 0 : i32
    %c0_i32_0 = arith.constant 0 : i32
    %c0_i32_1 = arith.constant 0 : i32
    return %c0_i32, %c0_i32_0 : i32, i32
  }
  func.func @transform_4(%arg0: i32, %arg1: i32) -> (i32, i32) {
    %c0_i32 = arith.constant 0 : i32
    %c0_i32_0 = arith.constant 0 : i32
    %c0_i32_1 = arith.constant 0 : i32
    return %c0_i32, %c0_i32_0 : i32, i32
  }
  func.func @transform_5(%arg0: i32, %arg1: i32) -> (i32, i32) {
    %c0_i32 = arith.constant 0 : i32
    %c0_i32_0 = arith.constant 0 : i32
    %c0_i32_1 = arith.constant 0 : i32
    return %c0_i32, %c0_i32_0 : i32, i32
  }
  func.func @transform_6(%arg0: i32, %arg1: i32) -> (i32, i32) {
    %c0_i32 = arith.constant 0 : i32
    %c0_i32_0 = arith.constant 0 : i32
    return %arg0, %c0_i32 : i32, i32
  }
}

</mosaic_0001>

<bundles_post_ra>
// kernel: tpu_custom_call.1
= control target key start
LH: loop header
LB: loop body
LE: loop exit
PB: predicated region body
PF: predicated region fallthrough
CT: control target
= control target key end

     0   :  { %11 = vsyncpa [#allocation6], 0  ;;  %s3468_s0 = inlined_call_operand.vmem [shape: f32[1,1,64,16], index: 0, kind: input, shape index: {}]   ;;  %s3469_s1 = inlined_call_operand.vmem [shape: f32[16,512], index: 1, kind: input, shape index: {}]   ;;  %s3470_s2 = inlined_call_operand.hbm [shape: f32[128,512], index: 2, kind: input, shape index: {}]   ;;  %s3471_s3 = inlined_call_operand.vmem [shape: f32[1,512], index: 3, kind: input, shape index: {}]   ;;  %s3472_s4 = inlined_call_operand.hbm [shape: f32[128,128], index: 4, kind: input, shape index: {}]   ;;  %s3473_s5 = inlined_call_operand.vmem [shape: f32[1,128], index: 5, kind: input, shape index: {}]   ;;  %s3474_s6 = inlined_call_operand.hbm [shape: f32[8,128], index: 6, kind: output, shape index: {}]  }
   0x1   :  { %12 = vsyncpa [#allocation9], 0 }
   0x2   :  { %13 = vsyncpa [#allocation7], 0  ;;  %s2894_s21 = smov [#allocation5]   ;;  %s2822_s25 = scalar_lea.hbm %s3470_s2, 8192 }
   0x3   :  { %s23_s22 = sshll.u32 %s2894_s21, 4  ;;  %p2823_p0 = scmp.ne.s32.totalorder %s3470_s2, %s2822_s25  ;;  %s24_s22 = int_to_ptr.vmem [resolvable:$true] %s23_s22 }
   0x4   :  { %p2826_p1 = scmp.lt.u32.totalorder %s2822_s25, %s3470_s2 }
   0x6   :  { %p2828_p2 = pnand %p2826_p1, %p2823_p0 }
   0x8   :  { %2831 = shalt.err (!%p2828_p2)
}
   0x9   :  { %s2832_s30 = scalar_lea.vmem %s24_s22, 8192  ;;  %p2837_p4 = scmp.lt.s32.totalorder %s24_s22, %s24_s22 }
   0xa   :  { %p2833_p3 = scmp.ne.s32.totalorder %s24_s22, %s2832_s30  ;;  %p2838_p5 = scmp.lt.s32.totalorder %s2832_s30, %s2832_s30 }
   0xc   :  { %p2839_p6 = por %p2838_p5, %p2837_p4 }
   0xe   :  { %p2840_p7 = pnand %p2839_p6, %p2833_p3 }
  0x10   :  { %2843 = shalt.err (!%p2840_p7)
}
  0x11   :  { %s2895_s7 = smov 512   ;;  %s2896_s8 = smov 32  }
  0x12   :  { %29 = dma.hbm_to_vmem [thread:$0]  %s3470_s2, 8192, %s24_s22, [#allocation6], %s2895_s7, %s2895_s7, %s2896_s8  }
  0x13   :  { %s2897_s11 = smov [#allocation8]   ;;  %s2844_s15 = scalar_lea.hbm %s3472_s4, 2048 }
  0x14   :  { %s37_s12 = sshll.u32 %s2897_s11, 4  ;;  %p2845_p8 = scmp.ne.s32.totalorder %s3472_s4, %s2844_s15  ;;  %s38_s12 = int_to_ptr.vmem [resolvable:$true] %s37_s12 }
  0x15   :  { %p2848_p9 = scmp.lt.u32.totalorder %s2844_s15, %s3472_s4 }
  0x17   :  { %p2850_p10 = pnand %p2848_p9, %p2845_p8 }
  0x19   :  { %2853 = shalt.err (!%p2850_p10)
}
  0x1a   :  { %s2854_s20 = scalar_lea.vmem %s38_s12, 2048  ;;  %p2859_p12 = scmp.lt.s32.totalorder %s38_s12, %s38_s12 }
  0x1b   :  { %p2855_p11 = scmp.ne.s32.totalorder %s38_s12, %s2854_s20  ;;  %p2860_p13 = scmp.lt.s32.totalorder %s2854_s20, %s2854_s20 }
  0x1d   :  { %p2861_p0 = por %p2860_p13, %p2859_p12 }
  0x1f   :  { %p2862_p1 = pnand %p2861_p0, %p2855_p11 }
  0x21   :  { %2865 = shalt.err (!%p2862_p1)
}
  0x22   :  { %s2898_s2 = smov 128   ;;  %s2899_s21 = smov 8  }
  0x23   :  { %43 = dma.hbm_to_vmem [thread:$0]  %s3472_s4, 2048, %s38_s12, [#allocation9], %s2898_s2, %s2898_s2, %s2899_s21  }
  0x24   :  { %2888 = dma.done.wait [#allocation6], 8192  }
  0x25   :  { %2889 = vsyncadd [#allocation6], 4294959104 }
  0x26   :  { %2890 = dma.done.wait [#allocation9], 2048  }
  0x27   :  { %2891 = vsyncadd [#allocation9], 4294965248  ;;  %v2900_v0 = vmov 0.0   ;;  %v67_v1 = vld [vmem:[%s3469_s1 + $0x8] sm:$0xff]  ;;  %v69_v3 = vld [vmem:[%s3469_s1 + $0x18] sm:$0xff]  ;;  %vm96_vm0 = vcmask 130048  }
  0x28   :  { %185 = vmatprep.mubr.f32.mxu0 %v2900_v0  ;;  %298 = vmatprep.mubr.f32.mxu1 %v2900_v0  ;;  %v71_v2 = vld [vmem:[%s3469_s1 + $0x28] sm:$0xff]  ;;  %v73_v5 = vld [vmem:[%s3469_s1 + $0x38] sm:$0xff]  ;;  %v66_v6 = vld [vmem:[%s3469_s1] sm:$0xff]  ;;  %vm2902_vm1 = vmmov 0   ;;  %s2903_s30 = smov [#allocation10]  }
  0x29   :  { %v2076_v4 = vpack.c.bf16 %v71_v2, %v67_v1  ;;  %v70_v7 = vld [vmem:[%s3469_s1 + $0x20] sm:$0xff]  ;;  %v2080_v8 = vpack.c.bf16 %v73_v5, %v69_v3  ;;  %v68_v10 = vld [vmem:[%s3469_s1 + $0x10] sm:$0xff]  ;;  %v389_v14 = vld [vmem:[#allocation5 + $0x8] sm:$0xff]  ;;  %s1966_s7 = sshll.u32 %s2903_s30, 4  ;;  %s1967_s7 = int_to_ptr.vmem [resolvable:$true] %s1966_s7 }
  0x2a   :  { %v2078_v9 = vpack.c.bf16 %v70_v7, %v66_v6  ;;  %v72_v11 = vld [vmem:[%s3469_s1 + $0x30] sm:$0xff]  ;;  %v58_v12 = vld [vmem:[%s3468_s0] sm:$0xff]  ;;  %v393_v15 = vld [vmem:[#allocation5 + $0x28] sm:$0xff]  ;;  %s2866_s8 = scalar_lea.vmem %s1967_s7, 128  ;;  %p2871_p3 = scmp.lt.s32.totalorder %s1967_s7, %s1967_s7 }
  0x2b   :  { %2077 = vmatprep.subr.bf16.mxu0 %v2076_v4  ;;  %v2082_v13 = vpack.c.bf16 %v72_v11, %v68_v10  ;;  %v391_v16 = vld [vmem:[#allocation5 + $0x18] sm:$0xff]  ;;  %2081 = vmatprep.subr.bf16.mxu1 %v2080_v8  ;;  %v2992_v17 = vpack.c.bf16 %v393_v15, %v389_v14  ;;  %v388_v19 = vld [vmem:[#allocation5] sm:$0xff]  ;;  %v390_v23 = vld [vmem:[#allocation5 + $0x10] sm:$0xff]  ;;  %p2867_p2 = scmp.ne.s32.totalorder %s1967_s7, %s2866_s8  ;;  %p2872_p4 = scmp.lt.s32.totalorder %s2866_s8, %s2866_s8 }
  0x2c   :  { %2079 = vmatpush1.bf16.msra.mxu0 %v2078_v9  ;;  %v395_v18 = vld [vmem:[#allocation5 + $0x38] sm:$0xff]  ;;  %v392_v20 = vld [vmem:[#allocation5 + $0x20] sm:$0xff]  ;;  %v394_v24 = vld [vmem:[#allocation5 + $0x30] sm:$0xff] }
  0x2d   :  { %2083 = vmatpush1.bf16.msra.mxu1 %v2082_v13  ;;  %v2994_v21 = vpack.c.bf16 %v395_v18, %v391_v16  ;;  %v2996_v22 = vpack.c.bf16 %v392_v20, %v388_v19  ;;  %2085 = vmatprep.subr.bf16.mxu0 %v2992_v17  ;;  %v2999_v25 = vpack.c.bf16 %v394_v24, %v390_v23  ;;  %v397_v26 = vld [vmem:[#allocation5 + $0x48] sm:$0xff]  ;;  %v399_v28 = vld [vmem:[#allocation5 + $0x58] sm:$0xff]  ;;  %v396_v31 = vld [vmem:[#allocation5 + $0x40] sm:$0xff]  ;;  %p2873_p5 = por %p2872_p4, %p2871_p3 }
  0x2e   :  { %v401_v27 = vld [vmem:[#allocation5 + $0x68] sm:$0xff]  ;;  %v403_v30 = vld [vmem:[#allocation5 + $0x78] sm:$0xff]  ;;  %v400_v32 = vld [vmem:[#allocation5 + $0x60] sm:$0xff] }
  0x2f   :  { %1983 = vmatmul.mubr.msk.f32.vlgmr.msra.gmra.mrb[0].mxu0 %vm96_vm0, %v58_v12  ;;  %2117 = vmatprep.subr.bf16.mxu1 %v2994_v21  ;;  %v3003_v29 = vpack.c.bf16 %v401_v27, %v397_v26  ;;  %v59_v33 = vld [vmem:[%s3468_s0 + $0x8] sm:$0xff]  ;;  %v3010_v34 = vpack.c.bf16 %v403_v30, %v399_v28  ;;  %v3012_v35 = vpack.c.bf16 %v400_v32, %v396_v31  ;;  %v398_v36 = vld [vmem:[#allocation5 + $0x50] sm:$0xff]  ;;  %v407_v41 = vld [vmem:[#allocation5 + $0x98] sm:$0xff]  ;;  %p2874_p6 = pnand %p2873_p5, %p2867_p2 }
  0x30   :  { %1991 = vmatmul.mubr.msk.f32.vlgmr.msra.gmra.mrb[0].mxu1 %vm96_vm0, %v58_v12  ;;  %2087 = vmatpush1.bf16.msra.mxu0 %v2996_v22  ;;  %v402_v37 = vld [vmem:[#allocation5 + $0x70] sm:$0xff]  ;;  %v405_v39 = vld [vmem:[#allocation5 + $0x88] sm:$0xff]  ;;  %v411_v43 = vld [vmem:[#allocation5 + $0xb8] sm:$0xff] }
  0x31   :  { %2119 = vmatpush1.bf16.msra.mxu1 %v2999_v25  ;;  %191 = vmatprep.mubr.f32.mxu0 %v2900_v0  ;;  %v3016_v38 = vpack.c.bf16 %v402_v37, %v398_v36  ;;  %v409_v40 = vld [vmem:[#allocation5 + $0xa8] sm:$0xff]  ;;  %v404_v44 = vld [vmem:[#allocation5 + $0x80] sm:$0xff]  ;;  %v60_v46 = vld [vmem:[%s3468_s0 + $0x10] sm:$0xff]  ;;  %v3027_v47 = vpack.c.bf16 %v411_v43, %v407_v41 }
  0x32   :  { %304 = vmatprep.mubr.f32.mxu1 %v2900_v0  ;;  %2089 = vmatprep.subr.bf16.mxu0 %v3003_v29  ;;  %v3020_v42 = vpack.c.bf16 %v409_v40, %v405_v39  ;;  %v408_v45 = vld [vmem:[#allocation5 + $0xa0] sm:$0xff]  ;;  %v406_v48 = vld [vmem:[#allocation5 + $0x90] sm:$0xff]  ;;  %v413_v51 = vld [vmem:[#allocation5 + $0xc8] sm:$0xff] }
  0x33   :  { %1984 = vmatmul.mubr.msk.f32.gmra.mrb[2].mxu0 %vm96_vm0, %v59_v33  ;;  %2121 = vmatprep.subr.bf16.mxu1 %v3010_v34  ;;  %v410_v49 = vld [vmem:[#allocation5 + $0xb0] sm:$0xff]  ;;  %v3031_v50 = vpack.c.bf16 %v408_v45, %v404_v44  ;;  %v417_v52 = vld [vmem:[#allocation5 + $0xe8] sm:$0xff]  ;;  %v415_v53 = vld [vmem:[#allocation5 + $0xd8] sm:$0xff] }
  0x34   :  { %1992 = vmatmul.mubr.msk.f32.gmra.mrb[2].mxu1 %vm96_vm0, %v59_v33  ;;  %2091 = vmatpush1.bf16.msra.mxu0 %v3012_v35  ;;  %v3035_v54 = vpack.c.bf16 %v410_v49, %v406_v48  ;;  %v419_v55 = vld [vmem:[#allocation5 + $0xf8] sm:$0xff]  ;;  %v412_v56 = vld [vmem:[#allocation5 + $0xc0] sm:$0xff]  ;;  %v3039_v58 = vpack.c.bf16 %v417_v52, %v413_v51  ;;  %v414_v59 = vld [vmem:[#allocation5 + $0xd0] sm:$0xff] }
  0x35   :  { %2123 = vmatpush1.bf16.msra.mxu1 %v3016_v38  ;;  %197 = vmatprep.mubr.f32.mxu0 %v2900_v0  ;;  %v416_v57 = vld [vmem:[#allocation5 + $0xe0] sm:$0xff]  ;;  %v418_v60 = vld [vmem:[#allocation5 + $0xf0] sm:$0xff]  ;;  %v3043_v61 = vpack.c.bf16 %v419_v55, %v415_v53  ;;  %v421_v62 = vld [vmem:[#allocation5 + $0x108] sm:$0xff] }
  0x36   :  { %310 = vmatprep.mubr.f32.mxu1 %v2900_v0  ;;  %2093 = vmatprep.subr.bf16.mxu0 %v3020_v42  ;;  %v425_v63 = vld [vmem:[#allocation5 + $0x128] sm:$0xff]  ;;  %v61_v1 = vld [vmem:[%s3468_s0 + $0x18] sm:$0xff]  ;;  %v3050_v2 = vpack.c.bf16 %v416_v57, %v412_v56  ;;  %v3054_v5 = vpack.c.bf16 %v418_v60, %v414_v59  ;;  %v420_v6 = vld [vmem:[#allocation5 + $0x100] sm:$0xff] }
  0x37   :  { %1985 = vmatmul.mubr.msk.f32.gmra.mrb[4].mxu0 %vm96_vm0, %v60_v46  ;;  %2125 = vmatprep.subr.bf16.mxu1 %v3027_v47  ;;  %v423_v3 = vld [vmem:[#allocation5 + $0x118] sm:$0xff]  ;;  %v424_v7 = vld [vmem:[#allocation5 + $0x120] sm:$0xff]  ;;  %v3058_v8 = vpack.c.bf16 %v425_v63, %v421_v62  ;;  %v422_v9 = vld [vmem:[#allocation5 + $0x110] sm:$0xff] }
  0x38   :  { %1993 = vmatmul.mubr.msk.f32.gmra.mrb[4].mxu1 %vm96_vm0, %v60_v46  ;;  %2095 = vmatpush1.bf16.msra.mxu0 %v3031_v50  ;;  %v427_v4 = vld [vmem:[#allocation5 + $0x138] sm:$0xff]  ;;  %v426_v10 = vld [vmem:[#allocation5 + $0x130] sm:$0xff]  ;;  %v429_v12 = vld [vmem:[#allocation5 + $0x148] sm:$0xff]  ;;  %v3069_v15 = vpack.c.bf16 %v424_v7, %v420_v6  ;;  %v76_v7 = vlaneseq }
  0x39   :  { %2127 = vmatpush1.bf16.msra.mxu1 %v3035_v54  ;;  %203 = vmatprep.mubr.f32.mxu0 %v2900_v0  ;;  %v3062_v11 = vpack.c.bf16 %v427_v4, %v423_v3  ;;  %v433_v13 = vld [vmem:[#allocation5 + $0x168] sm:$0xff]  ;;  %v62_v14 = vld [vmem:[%s3468_s0 + $0x20] sm:$0xff]  ;;  %v431_v16 = vld [vmem:[#allocation5 + $0x158] sm:$0xff]  ;;  %v3073_v19 = vpack.c.bf16 %v426_v10, %v422_v9 }
  0x3a   :  { %316 = vmatprep.mubr.f32.mxu1 %v2900_v0  ;;  %2097 = vmatprep.subr.bf16.mxu0 %v3039_v58  ;;  %v435_v18 = vld [vmem:[#allocation5 + $0x178] sm:$0xff]  ;;  %v428_v20 = vld [vmem:[#allocation5 + $0x140] sm:$0xff]  ;;  %v3077_v24 = vpack.c.bf16 %v433_v13, %v429_v12  ;;  %v430_v26 = vld [vmem:[#allocation5 + $0x150] sm:$0xff]  ;;  %v77_v9 = vshrl.u32 %v76_v7, 7 }
  0x3b   :  { %1986 = vmatmul.mubr.msk.f32.gmra.mrb[6].mxu0 %vm96_vm0, %v61_v1  ;;  %2129 = vmatprep.subr.bf16.mxu1 %v3043_v61  ;;  %v432_v23 = vld [vmem:[#allocation5 + $0x160] sm:$0xff]  ;;  %v434_v27 = vld [vmem:[#allocation5 + $0x170] sm:$0xff]  ;;  %v3081_v28 = vpack.c.bf16 %v435_v18, %v431_v16  ;;  %v437_v30 = vld [vmem:[#allocation5 + $0x188] sm:$0xff] }
  0x3c   :  { %1994 = vmatmul.mubr.msk.f32.gmra.mrb[6].mxu1 %vm96_vm0, %v61_v1  ;;  %2099 = vmatpush1.bf16.msra.mxu0 %v3050_v2  ;;  %v441_v31 = vld [vmem:[#allocation5 + $0x1a8] sm:$0xff]  ;;  %v3088_v33 = vpack.c.bf16 %v432_v23, %v428_v20  ;;  %v439_v36 = vld [vmem:[#allocation5 + $0x198] sm:$0xff]  ;;  %v3092_v39 = vpack.c.bf16 %v434_v27, %v430_v26  ;;  %v436_v40 = vld [vmem:[#allocation5 + $0x180] sm:$0xff]  ;;  %v78_v10 = vsub.s32 0, %v77_v9  ;;  %v82_v13 = vsub.s32 1, %v77_v9 }
  0x3d   :  { %2131 = vmatpush1.bf16.msra.mxu1 %v3054_v5  ;;  %209 = vmatprep.mubr.f32.mxu0 %v2900_v0  ;;  %v63_v32 = vld [vmem:[%s3468_s0 + $0x28] sm:$0xff]  ;;  %v443_v37 = vld [vmem:[#allocation5 + $0x1b8] sm:$0xff]  ;;  %v440_v41 = vld [vmem:[#allocation5 + $0x1a0] sm:$0xff]  ;;  %v3096_v43 = vpack.c.bf16 %v441_v31, %v437_v30  ;;  %v86_v20 = vsub.s32 2, %v77_v9 }
  0x3e   :  { %322 = vmatprep.mubr.f32.mxu1 %v2900_v0  ;;  %2101 = vmatprep.subr.bf16.mxu0 %v3058_v8  ;;  %v438_v44 = vld [vmem:[#allocation5 + $0x190] sm:$0xff]  ;;  %v3100_v46 = vpack.c.bf16 %v443_v37, %v439_v36  ;;  %v445_v48 = vld [vmem:[#allocation5 + $0x1c8] sm:$0xff]  ;;  %v3107_v52 = vpack.c.bf16 %v440_v41, %v436_v40  ;;  %v447_v53 = vld [vmem:[#allocation5 + $0x1d8] sm:$0xff]  ;;  %v90_v40 = vsub.s32 3, %v77_v9 }
  0x3f   :  { %1987 = vmatmul.mubr.msk.f32.gmra.mrb[8].mxu0 %vm96_vm0, %v62_v14  ;;  %2133 = vmatprep.subr.bf16.mxu1 %v3062_v11  ;;  %v442_v45 = vld [vmem:[#allocation5 + $0x1b0] sm:$0xff]  ;;  %v449_v49 = vld [vmem:[#allocation5 + $0x1e8] sm:$0xff]  ;;  %v451_v55 = vld [vmem:[#allocation5 + $0x1f8] sm:$0xff] }
  0x40   :  { %1995 = vmatmul.mubr.msk.f32.gmra.mrb[8].mxu1 %vm96_vm0, %v62_v14  ;;  %2103 = vmatpush1.bf16.msra.mxu0 %v3069_v15  ;;  %v64_v51 = vld [vmem:[%s3468_s0 + $0x30] sm:$0xff]  ;;  %v3111_v56 = vpack.c.bf16 %v442_v45, %v438_v44  ;;  %v444_v57 = vld [vmem:[#allocation5 + $0x1c0] sm:$0xff]  ;;  %v3115_v60 = vpack.c.bf16 %v449_v49, %v445_v48  ;;  %v3119_v1 = vpack.c.bf16 %v451_v55, %v447_v53  ;;  %v65_v3 = vld [vmem:[%s3468_s0 + $0x38] sm:$0xff] }
  0x41   :  { %2135 = vmatpush1.bf16.msra.mxu1 %v3073_v19  ;;  %215 = vmatprep.mubr.f32.mxu0 %v2900_v0  ;;  %v448_v59 = vld [vmem:[#allocation5 + $0x1e0] sm:$0xff]  ;;  %v446_v62 = vld [vmem:[#allocation5 + $0x1d0] sm:$0xff] }
  0x42   :  { %328 = vmatprep.mubr.f32.mxu1 %v2900_v0  ;;  %2105 = vmatprep.subr.bf16.mxu0 %v3077_v24  ;;  %v450_v63 = vld [vmem:[#allocation5 + $0x1f0] sm:$0xff]  ;;  %v3126_v4 = vpack.c.bf16 %v448_v59, %v444_v57  ;;  %v74_v12 = vld [vmem:[%s3471_s3] sm:$0xf] }
  0x43   :  { %1988 = vmatmul.mubr.msk.f32.gmra.mrb[10].mxu0 %vm96_vm0, %v63_v32  ;;  %2137 = vmatprep.subr.bf16.mxu1 %v3081_v28  ;;  %v3130_v6 = vpack.c.bf16 %v450_v63, %v446_v62  ;;  %v3182_v14 = vrot.slane %v74_v12, %v78_v10  ;;  %v3184_v16 = vrot.slane %v74_v12, %v82_v13 }
  0x44   :  { %1996 = vmatmul.mubr.msk.f32.gmra.mrb[10].mxu1 %vm96_vm0, %v63_v32  ;;  %2107 = vmatpush1.bf16.msra.mxu0 %v3088_v33  ;;  %v3188_v36 = vrot.slane %v74_v12, %v86_v20  ;;  %v3191_v44 = vrot.slane %v74_v12, %v90_v40 }
  0x45   :  { %2139 = vmatpush1.bf16.msra.mxu1 %v3092_v39  ;;  %221 = vmatprep.mubr.f32.mxu0 %v2900_v0 }
  0x46   :  { %334 = vmatprep.mubr.f32.mxu1 %v2900_v0  ;;  %2109 = vmatprep.subr.bf16.mxu0 %v3096_v43 }
  0x47   :  { %1989 = vmatmul.mubr.msk.f32.gmra.mrb[12].mxu0 %vm96_vm0, %v64_v51  ;;  %2141 = vmatprep.subr.bf16.mxu1 %v3100_v46 }
  0x48   :  { %1997 = vmatmul.mubr.msk.f32.gmra.mrb[12].mxu1 %vm96_vm0, %v64_v51  ;;  %2111 = vmatpush1.bf16.msra.mxu0 %v3107_v52 }
  0x49   :  { %2143 = vmatpush1.bf16.msra.mxu1 %v3111_v56  ;;  %227 = vmatprep.mubr.f32.mxu0 %v2900_v0 }
  0x4a   :  { %340 = vmatprep.mubr.f32.mxu1 %v2900_v0  ;;  %2113 = vmatprep.subr.bf16.mxu0 %v3115_v60 }
  0x4b   :  { %1990 = vmatmul.mubr.msk.f32.gmra.mrb[14].mxu0 %vm96_vm0, %v65_v3  ;;  %2145 = vmatprep.subr.bf16.mxu1 %v3119_v1 }
  0x4c   :  { %1998 = vmatmul.mubr.msk.f32.gmra.mrb[14].mxu1 %vm96_vm0, %v65_v3  ;;  %2115 = vmatpush1.bf16.msra.mxu0 %v3126_v4 }
  0x4d   :  { %2147 = vmatpush1.bf16.msra.mxu1 %v3130_v6  ;;  %516 = vmatprep.mubr.f32.mxu0 %v2900_v0 }
  0x4e   :  { %587 = vmatprep.mubr.f32.mxu1 %v2900_v0  ;;  %2149 = vmatprep.subr.bf16.mxu0 %v2992_v17 }
  0x4f   :  { %517 = vmatmul.mubr.f32.vlgmr.msra.gmra.mrb[0].mxu0 %v2900_v0  ;;  %2181 = vmatprep.subr.bf16.mxu1 %v2994_v21 }
  0x50   :  { %588 = vmatmul.mubr.f32.vlgmr.msra.gmra.mrb[0].mxu1 %v2900_v0  ;;  %2151 = vmatpush1.bf16.msra.mxu0 %v2996_v22 }
  0x51   :  { %2183 = vmatpush1.bf16.msra.mxu1 %v2999_v25  ;;  %2153 = vmatprep.subr.bf16.mxu0 %v3003_v29 }
  0x52   :  { %2185 = vmatprep.subr.bf16.mxu1 %v3010_v34  ;;  %693 = vmatprep.mubr.f32.mxu0 %v2900_v0 }
  0x53   :  { %764 = vmatprep.mubr.f32.mxu1 %v2900_v0 }
  0x54   :  { %2155 = vmatpush1.bf16.msra.mxu0 %v3012_v35 }
  0x55   :  { %2187 = vmatpush1.bf16.msra.mxu1 %v3016_v38  ;;  %2157 = vmatprep.subr.bf16.mxu0 %v3020_v42 }
  0x56   :  { %2189 = vmatprep.subr.bf16.mxu1 %v3027_v47 }
  0x58   :  { %2159 = vmatpush1.bf16.msra.mxu0 %v3031_v50 }
  0x59   :  { %2191 = vmatpush1.bf16.msra.mxu1 %v3035_v54  ;;  %2161 = vmatprep.subr.bf16.mxu0 %v3039_v58 }
  0x5a   :  { %2193 = vmatprep.subr.bf16.mxu1 %v3043_v61 }
  0x5c   :  { %2163 = vmatpush1.bf16.msra.mxu0 %v3050_v2 }
  0x5d   :  { %2195 = vmatpush1.bf16.msra.mxu1 %v3054_v5  ;;  %2165 = vmatprep.subr.bf16.mxu0 %v3058_v8 }
  0x5e   :  { %2197 = vmatprep.subr.bf16.mxu1 %v3062_v11 }
  0x60   :  { %2167 = vmatpush1.bf16.msra.mxu0 %v3069_v15 }
  0x61   :  { %2199 = vmatpush1.bf16.msra.mxu1 %v3073_v19  ;;  %2169 = vmatprep.subr.bf16.mxu0 %v3077_v24 }
  0x62   :  { %2201 = vmatprep.subr.bf16.mxu1 %v3081_v28 }
  0x64   :  { %2171 = vmatpush1.bf16.msra.mxu0 %v3088_v33 }
  0x65   :  { %2203 = vmatpush1.bf16.msra.mxu1 %v3092_v39  ;;  %2173 = vmatprep.subr.bf16.mxu0 %v3096_v43 }
  0x66   :  { %2205 = vmatprep.subr.bf16.mxu1 %v3100_v46 }
  0x68   :  { %2175 = vmatpush1.bf16.msra.mxu0 %v3107_v52 }
  0x69   :  { %2207 = vmatpush1.bf16.msra.mxu1 %v3111_v56  ;;  %2177 = vmatprep.subr.bf16.mxu0 %v3115_v60 }
  0x6a   :  { %2209 = vmatprep.subr.bf16.mxu1 %v3119_v1 }
  0x6c   :  { %2179 = vmatpush1.bf16.msra.mxu0 %v3126_v4 }
  0x6d   :  { %2211 = vmatpush1.bf16.msra.mxu1 %v3130_v6  ;;  %2213 = vmatprep.subr.bf16.mxu0 %v2992_v17 }
  0x6e   :  { %2245 = vmatprep.subr.bf16.mxu1 %v2994_v21 }
 0x122   :  { %v518_v18 = vpop.f32.mrb[0].mxu0 }
 0x123   :  { %v2620_v23 = vadd.f32 %v518_v18, %v3182_v14  ;;  %v589_v26 = vpop.f32.mrb[0].mxu1  ;;  %v520_v27 = vpop.f32.mrb[1].mxu0 }
 0x124   :  { %v2621_v30 = vadd.f32 %v520_v27, %v3184_v16  ;;  %v591_v31 = vpop.f32.mrb[1].mxu1  ;;  %v2636_v41 = vadd.f32 %v589_v26, %v3188_v36 }
 0x125   :  { %v1999_v32 = vmul.f32 -1.442695, %v2620_v23  ;;  %v2637_v48 = vadd.f32 %v591_v31, %v3191_v44 }
 0x126   :  { %v2000_v37 = vmul.f32 -1.442695, %v2621_v30  ;;  %v2001_v45 = vmul.f32 -1.442695, %v2636_v41 }
 0x127   :  { %2694 = vpow2.f32 %v1999_v32 }
 0x128   :  { %2696 = vpow2.f32 %v2000_v37 }
 0x129   :  { %2698 = vpow2.f32 %v2001_v45 }
 0x12a   :  { %2700 = vtanh.f32 %v2637_v48 }
 0x131   :  { %v2695_v49 = vpop.eup %2694 }
 0x132   :  { %v607_v51 = vadd.f32 1.0, %v2695_v49  ;;  %v2697_v53 = vpop.eup %2696 }
 0x133   :  { %v608_v55 = vadd.f32 1.0, %v2697_v53  ;;  %v2699_v57 = vpop.eup %2698 }
 0x134   :  { %2702 = vrcp.f32 %v607_v51  ;;  %v2701_v59 = vpop.eup %2700  ;;  %v609_v7 = vadd.f32 1.0, %v2699_v57 }
 0x135   :  { %2704 = vrcp.f32 %v608_v55 }
 0x136   :  { %2706 = vrcp.f32 %v609_v7 }
 0x13e   :  { %v2703_v62 = vpop.eup %2702 }
 0x13f   :  { %v618_v63 = vmul.f32 %v2703_v62, %v2701_v59  ;;  %v2705_v3 = vpop.eup %2704 }
 0x140   :  { %v617_v9 = vmul.f32 0.0, %v2705_v3  ;;  %v2707_v12 = vpop.eup %2706 }
 0x142   :  { %v3194_v10 = vadd.f32 %v618_v63, %v617_v9 }
 0x144   :  { %2708 = vtanh.f32 %v3194_v10 }
 0x14e   :  { %v2709_v13 = vpop.eup %2708 }
 0x14f   :  { %v621_v18 = vmul.f32 %v2709_v13, %v2707_v12 }
 0x151   :  { %694 = vmatmul.mubr.f32.vlgmr.msra.gmra.mrb[2].mxu0 %v621_v18  ;;  %765 = vmatmul.mubr.f32.vlgmr.msra.gmra.mrb[2].mxu1 %v621_v18 }
 0x152   :  { %2215 = vmatpush1.bf16.msra.mxu0 %v2996_v22  ;;  %2247 = vmatpush1.bf16.msra.mxu1 %v2999_v25 }
 0x153   :  { %2217 = vmatprep.subr.bf16.mxu0 %v3003_v29  ;;  %2249 = vmatprep.subr.bf16.mxu1 %v3010_v34 }
 0x154   :  { %870 = vmatprep.mubr.f32.mxu0 %v2900_v0  ;;  %941 = vmatprep.mubr.f32.mxu1 %v2900_v0 }
 0x156   :  { %2219 = vmatpush1.bf16.msra.mxu0 %v3012_v35  ;;  %2251 = vmatpush1.bf16.msra.mxu1 %v3016_v38 }
 0x157   :  { %2221 = vmatprep.subr.bf16.mxu0 %v3020_v42  ;;  %2253 = vmatprep.subr.bf16.mxu1 %v3027_v47 }
 0x15a   :  { %2223 = vmatpush1.bf16.msra.mxu0 %v3031_v50  ;;  %2255 = vmatpush1.bf16.msra.mxu1 %v3035_v54 }
 0x15b   :  { %2225 = vmatprep.subr.bf16.mxu0 %v3039_v58  ;;  %2257 = vmatprep.subr.bf16.mxu1 %v3043_v61 }
 0x15e   :  { %2227 = vmatpush1.bf16.msra.mxu0 %v3050_v2  ;;  %2259 = vmatpush1.bf16.msra.mxu1 %v3054_v5 }
 0x15f   :  { %2229 = vmatprep.subr.bf16.mxu0 %v3058_v8  ;;  %2261 = vmatprep.subr.bf16.mxu1 %v3062_v11 }
 0x162   :  { %2231 = vmatpush1.bf16.msra.mxu0 %v3069_v15  ;;  %2263 = vmatpush1.bf16.msra.mxu1 %v3073_v19 }
 0x163   :  { %2233 = vmatprep.subr.bf16.mxu0 %v3077_v24  ;;  %2265 = vmatprep.subr.bf16.mxu1 %v3081_v28 }
 0x166   :  { %2235 = vmatpush1.bf16.msra.mxu0 %v3088_v33  ;;  %2267 = vmatpush1.bf16.msra.mxu1 %v3092_v39 }
 0x167   :  { %2237 = vmatprep.subr.bf16.mxu0 %v3096_v43  ;;  %2269 = vmatprep.subr.bf16.mxu1 %v3100_v46 }
 0x16a   :  { %2239 = vmatpush1.bf16.msra.mxu0 %v3107_v52  ;;  %2271 = vmatpush1.bf16.msra.mxu1 %v3111_v56 }
 0x16b   :  { %2241 = vmatprep.subr.bf16.mxu0 %v3115_v60  ;;  %2273 = vmatprep.subr.bf16.mxu1 %v3119_v1 }
 0x16e   :  { %2243 = vmatpush1.bf16.msra.mxu0 %v3126_v4  ;;  %2275 = vmatpush1.bf16.msra.mxu1 %v3130_v6 }
 0x16f   :  { %2277 = vmatprep.subr.bf16.mxu0 %v2992_v17  ;;  %2309 = vmatprep.subr.bf16.mxu1 %v2994_v21 }
 0x224   :  { %v695_v20 = vpop.f32.mrb[2].mxu0  ;;  %v766_v23 = vpop.f32.mrb[2].mxu1 }
 0x225   :  { %v2622_v26 = vadd.f32 %v695_v20, %v3182_v14  ;;  %v697_v27 = vpop.f32.mrb[3].mxu0  ;;  %v768_v30 = vpop.f32.mrb[3].mxu1  ;;  %v2638_v40 = vadd.f32 %v766_v23, %v3188_v36 }
 0x226   :  { %v2623_v31 = vadd.f32 %v697_v27, %v3184_v16  ;;  %v2639_v41 = vadd.f32 %v768_v30, %v3191_v44 }
 0x227   :  { %v2002_v32 = vmul.f32 -1.442695, %v2622_v26  ;;  %v2004_v45 = vmul.f32 -1.442695, %v2638_v40 }
 0x228   :  { %v2003_v37 = vmul.f32 -1.442695, %v2623_v31 }
 0x229   :  { %2710 = vpow2.f32 %v2002_v32 }
 0x22a   :  { %2712 = vpow2.f32 %v2003_v37 }
 0x22b   :  { %2714 = vtanh.f32 %v2639_v41 }
 0x22c   :  { %2716 = vpow2.f32 %v2004_v45 }
 0x233   :  { %v2711_v48 = vpop.eup %2710 }
 0x234   :  { %v784_v49 = vadd.f32 1.0, %v2711_v48  ;;  %v2713_v51 = vpop.eup %2712 }
 0x235   :  { %v785_v53 = vadd.f32 1.0, %v2713_v51  ;;  %v2715_v55 = vpop.eup %2714 }
 0x236   :  { %2718 = vrcp.f32 %v784_v49  ;;  %v2717_v57 = vpop.eup %2716 }
 0x237   :  { %2720 = vrcp.f32 %v785_v53  ;;  %v786_v3 = vadd.f32 1.0, %v2717_v57 }
 0x239   :  { %2722 = vrcp.f32 %v786_v3 }
 0x240   :  { %v2719_v59 = vpop.eup %2718 }
 0x241   :  { %v795_v62 = vmul.f32 %v2719_v59, %v2715_v55  ;;  %v2721_v63 = vpop.eup %2720 }
 0x242   :  { %v794_v7 = vmul.f32 %v2721_v63, %v3194_v10 }
 0x243   :  { %v2723_v12 = vpop.eup %2722 }
 0x244   :  { %v3236_v9 = vadd.f32 %v795_v62, %v794_v7 }
 0x246   :  { %2724 = vtanh.f32 %v3236_v9 }
 0x250   :  { %v2725_v13 = vpop.eup %2724 }
 0x251   :  { %v798_v18 = vmul.f32 %v2725_v13, %v2723_v12 }
 0x253   :  { %871 = vmatmul.mubr.f32.vlgmr.msra.gmra.mrb[4].mxu0 %v798_v18  ;;  %942 = vmatmul.mubr.f32.vlgmr.msra.gmra.mrb[4].mxu1 %v798_v18 }
 0x254   :  { %2279 = vmatpush1.bf16.msra.mxu0 %v2996_v22  ;;  %2311 = vmatpush1.bf16.msra.mxu1 %v2999_v25 }
 0x255   :  { %2281 = vmatprep.subr.bf16.mxu0 %v3003_v29  ;;  %2313 = vmatprep.subr.bf16.mxu1 %v3010_v34 }
 0x256   :  { %1047 = vmatprep.mubr.f32.mxu0 %v2900_v0  ;;  %1118 = vmatprep.mubr.f32.mxu1 %v2900_v0 }
 0x258   :  { %2283 = vmatpush1.bf16.msra.mxu0 %v3012_v35  ;;  %2315 = vmatpush1.bf16.msra.mxu1 %v3016_v38 }
 0x259   :  { %2285 = vmatprep.subr.bf16.mxu0 %v3020_v42  ;;  %2317 = vmatprep.subr.bf16.mxu1 %v3027_v47 }
 0x25c   :  { %2287 = vmatpush1.bf16.msra.mxu0 %v3031_v50  ;;  %2319 = vmatpush1.bf16.msra.mxu1 %v3035_v54 }
 0x25d   :  { %2289 = vmatprep.subr.bf16.mxu0 %v3039_v58  ;;  %2321 = vmatprep.subr.bf16.mxu1 %v3043_v61 }
 0x260   :  { %2291 = vmatpush1.bf16.msra.mxu0 %v3050_v2  ;;  %2323 = vmatpush1.bf16.msra.mxu1 %v3054_v5 }
 0x261   :  { %2293 = vmatprep.subr.bf16.mxu0 %v3058_v8  ;;  %2325 = vmatprep.subr.bf16.mxu1 %v3062_v11 }
 0x264   :  { %2295 = vmatpush1.bf16.msra.mxu0 %v3069_v15  ;;  %2327 = vmatpush1.bf16.msra.mxu1 %v3073_v19 }
 0x265   :  { %2297 = vmatprep.subr.bf16.mxu0 %v3077_v24  ;;  %2329 = vmatprep.subr.bf16.mxu1 %v3081_v28 }
 0x268   :  { %2299 = vmatpush1.bf16.msra.mxu0 %v3088_v33  ;;  %2331 = vmatpush1.bf16.msra.mxu1 %v3092_v39 }
 0x269   :  { %2301 = vmatprep.subr.bf16.mxu0 %v3096_v43  ;;  %2333 = vmatprep.subr.bf16.mxu1 %v3100_v46 }
 0x26c   :  { %2303 = vmatpush1.bf16.msra.mxu0 %v3107_v52  ;;  %2335 = vmatpush1.bf16.msra.mxu1 %v3111_v56 }
 0x26d   :  { %2305 = vmatprep.subr.bf16.mxu0 %v3115_v60  ;;  %2337 = vmatprep.subr.bf16.mxu1 %v3119_v1 }
 0x270   :  { %2307 = vmatpush1.bf16.msra.mxu0 %v3126_v4  ;;  %2339 = vmatpush1.bf16.msra.mxu1 %v3130_v6 }
 0x271   :  { %2341 = vmatprep.subr.bf16.mxu0 %v2992_v17  ;;  %2373 = vmatprep.subr.bf16.mxu1 %v2994_v21 }
 0x326   :  { %v872_v10 = vpop.f32.mrb[4].mxu0  ;;  %v943_v20 = vpop.f32.mrb[4].mxu1 }
 0x327   :  { %v2624_v23 = vadd.f32 %v872_v10, %v3182_v14  ;;  %v874_v26 = vpop.f32.mrb[5].mxu0  ;;  %v945_v27 = vpop.f32.mrb[5].mxu1  ;;  %v2640_v37 = vadd.f32 %v943_v20, %v3188_v36 }
 0x328   :  { %v2625_v30 = vadd.f32 %v874_v26, %v3184_v16  ;;  %v2641_v40 = vadd.f32 %v945_v27, %v3191_v44 }
 0x329   :  { %v2005_v31 = vmul.f32 -1.442695, %v2624_v23  ;;  %v2007_v41 = vmul.f32 -1.442695, %v2640_v37 }
 0x32a   :  { %v2006_v32 = vmul.f32 -1.442695, %v2625_v30 }
 0x32b   :  { %2726 = vpow2.f32 %v2005_v31 }
 0x32c   :  { %2728 = vpow2.f32 %v2006_v32 }
 0x32d   :  { %2730 = vtanh.f32 %v2641_v40 }
 0x32e   :  { %2732 = vpow2.f32 %v2007_v41 }
 0x335   :  { %v2727_v45 = vpop.eup %2726 }
 0x336   :  { %v961_v48 = vadd.f32 1.0, %v2727_v45  ;;  %v2729_v49 = vpop.eup %2728 }
 0x337   :  { %v962_v51 = vadd.f32 1.0, %v2729_v49  ;;  %v2731_v53 = vpop.eup %2730 }
 0x338   :  { %2734 = vrcp.f32 %v961_v48  ;;  %v2733_v55 = vpop.eup %2732 }
 0x339   :  { %2736 = vrcp.f32 %v962_v51  ;;  %v963_v63 = vadd.f32 1.0, %v2733_v55 }
 0x33b   :  { %2738 = vrcp.f32 %v963_v63 }
 0x342   :  { %v2735_v57 = vpop.eup %2734 }
 0x343   :  { %v972_v59 = vmul.f32 %v2735_v57, %v2731_v53  ;;  %v2737_v62 = vpop.eup %2736 }
 0x344   :  { %v971_v3 = vmul.f32 %v2737_v62, %v3236_v9 }
 0x345   :  { %v2739_v12 = vpop.eup %2738 }
 0x346   :  { %v3278_v7 = vadd.f32 %v972_v59, %v971_v3 }
 0x348   :  { %2740 = vtanh.f32 %v3278_v7 }
 0x352   :  { %v2741_v13 = vpop.eup %2740 }
 0x353   :  { %v975_v18 = vmul.f32 %v2741_v13, %v2739_v12 }
 0x355   :  { %1048 = vmatmul.mubr.f32.vlgmr.msra.gmra.mrb[6].mxu0 %v975_v18  ;;  %1119 = vmatmul.mubr.f32.vlgmr.msra.gmra.mrb[6].mxu1 %v975_v18 }
 0x356   :  { %2343 = vmatpush1.bf16.msra.mxu0 %v2996_v22  ;;  %2375 = vmatpush1.bf16.msra.mxu1 %v2999_v25 }
 0x357   :  { %2345 = vmatprep.subr.bf16.mxu0 %v3003_v29  ;;  %2377 = vmatprep.subr.bf16.mxu1 %v3010_v34 }
 0x358   :  { %1224 = vmatprep.mubr.f32.mxu0 %v2900_v0  ;;  %1295 = vmatprep.mubr.f32.mxu1 %v2900_v0 }
 0x35a   :  { %2347 = vmatpush1.bf16.msra.mxu0 %v3012_v35  ;;  %2379 = vmatpush1.bf16.msra.mxu1 %v3016_v38 }
 0x35b   :  { %2349 = vmatprep.subr.bf16.mxu0 %v3020_v42  ;;  %2381 = vmatprep.subr.bf16.mxu1 %v3027_v47 }
 0x35e   :  { %2351 = vmatpush1.bf16.msra.mxu0 %v3031_v50  ;;  %2383 = vmatpush1.bf16.msra.mxu1 %v3035_v54 }
 0x35f   :  { %2353 = vmatprep.subr.bf16.mxu0 %v3039_v58  ;;  %2385 = vmatprep.subr.bf16.mxu1 %v3043_v61 }
 0x362   :  { %2355 = vmatpush1.bf16.msra.mxu0 %v3050_v2  ;;  %2387 = vmatpush1.bf16.msra.mxu1 %v3054_v5 }
 0x363   :  { %2357 = vmatprep.subr.bf16.mxu0 %v3058_v8  ;;  %2389 = vmatprep.subr.bf16.mxu1 %v3062_v11 }
 0x366   :  { %2359 = vmatpush1.bf16.msra.mxu0 %v3069_v15  ;;  %2391 = vmatpush1.bf16.msra.mxu1 %v3073_v19 }
 0x367   :  { %2361 = vmatprep.subr.bf16.mxu0 %v3077_v24  ;;  %2393 = vmatprep.subr.bf16.mxu1 %v3081_v28 }
 0x36a   :  { %2363 = vmatpush1.bf16.msra.mxu0 %v3088_v33  ;;  %2395 = vmatpush1.bf16.msra.mxu1 %v3092_v39 }
 0x36b   :  { %2365 = vmatprep.subr.bf16.mxu0 %v3096_v43  ;;  %2397 = vmatprep.subr.bf16.mxu1 %v3100_v46 }
 0x36e   :  { %2367 = vmatpush1.bf16.msra.mxu0 %v3107_v52  ;;  %2399 = vmatpush1.bf16.msra.mxu1 %v3111_v56 }
 0x36f   :  { %2369 = vmatprep.subr.bf16.mxu0 %v3115_v60  ;;  %2401 = vmatprep.subr.bf16.mxu1 %v3119_v1 }
 0x372   :  { %2371 = vmatpush1.bf16.msra.mxu0 %v3126_v4  ;;  %2403 = vmatpush1.bf16.msra.mxu1 %v3130_v6 }
 0x373   :  { %2405 = vmatprep.subr.bf16.mxu0 %v2992_v17  ;;  %2437 = vmatprep.subr.bf16.mxu1 %v2994_v21 }
 0x428   :  { %v1049_v9 = vpop.f32.mrb[6].mxu0  ;;  %v1120_v10 = vpop.f32.mrb[6].mxu1 }
 0x429   :  { %v2626_v20 = vadd.f32 %v1049_v9, %v3182_v14  ;;  %v1051_v23 = vpop.f32.mrb[7].mxu0  ;;  %v1122_v26 = vpop.f32.mrb[7].mxu1  ;;  %v2642_v32 = vadd.f32 %v1120_v10, %v3188_v36 }
 0x42a   :  { %v2627_v27 = vadd.f32 %v1051_v23, %v3184_v16  ;;  %v2643_v37 = vadd.f32 %v1122_v26, %v3191_v44 }
 0x42b   :  { %v2008_v30 = vmul.f32 -1.442695, %v2626_v20  ;;  %v2010_v40 = vmul.f32 -1.442695, %v2642_v32 }
 0x42c   :  { %v2009_v31 = vmul.f32 -1.442695, %v2627_v27 }
 0x42d   :  { %2742 = vpow2.f32 %v2008_v30 }
 0x42e   :  { %2744 = vpow2.f32 %v2009_v31 }
 0x42f   :  { %2746 = vtanh.f32 %v2643_v37 }
 0x430   :  { %2748 = vpow2.f32 %v2010_v40 }
 0x437   :  { %v2743_v41 = vpop.eup %2742 }
 0x438   :  { %v1138_v45 = vadd.f32 1.0, %v2743_v41  ;;  %v2745_v48 = vpop.eup %2744 }
 0x439   :  { %v1139_v49 = vadd.f32 1.0, %v2745_v48  ;;  %v2747_v51 = vpop.eup %2746 }
 0x43a   :  { %2750 = vrcp.f32 %v1138_v45  ;;  %v2749_v53 = vpop.eup %2748 }
 0x43b   :  { %2752 = vrcp.f32 %v1139_v49  ;;  %v1140_v62 = vadd.f32 1.0, %v2749_v53 }
 0x43d   :  { %2754 = vrcp.f32 %v1140_v62 }
 0x444   :  { %v2751_v55 = vpop.eup %2750 }
 0x445   :  { %v1149_v57 = vmul.f32 %v2751_v55, %v2747_v51  ;;  %v2753_v59 = vpop.eup %2752 }
 0x446   :  { %v1148_v63 = vmul.f32 %v2753_v59, %v3278_v7 }
 0x447   :  { %v2755_v12 = vpop.eup %2754 }
 0x448   :  { %v3320_v3 = vadd.f32 %v1149_v57, %v1148_v63 }
 0x44a   :  { %2756 = vtanh.f32 %v3320_v3 }
 0x454   :  { %v2757_v13 = vpop.eup %2756 }
 0x455   :  { %v1152_v18 = vmul.f32 %v2757_v13, %v2755_v12 }
 0x457   :  { %1225 = vmatmul.mubr.f32.vlgmr.msra.gmra.mrb[8].mxu0 %v1152_v18  ;;  %1296 = vmatmul.mubr.f32.vlgmr.msra.gmra.mrb[8].mxu1 %v1152_v18 }
 0x458   :  { %2407 = vmatpush1.bf16.msra.mxu0 %v2996_v22  ;;  %2439 = vmatpush1.bf16.msra.mxu1 %v2999_v25 }
 0x459   :  { %2409 = vmatprep.subr.bf16.mxu0 %v3003_v29  ;;  %2441 = vmatprep.subr.bf16.mxu1 %v3010_v34 }
 0x45a   :  { %1401 = vmatprep.mubr.f32.mxu0 %v2900_v0  ;;  %1472 = vmatprep.mubr.f32.mxu1 %v2900_v0 }
 0x45c   :  { %2411 = vmatpush1.bf16.msra.mxu0 %v3012_v35  ;;  %2443 = vmatpush1.bf16.msra.mxu1 %v3016_v38 }
 0x45d   :  { %2413 = vmatprep.subr.bf16.mxu0 %v3020_v42  ;;  %2445 = vmatprep.subr.bf16.mxu1 %v3027_v47 }
 0x460   :  { %2415 = vmatpush1.bf16.msra.mxu0 %v3031_v50  ;;  %2447 = vmatpush1.bf16.msra.mxu1 %v3035_v54 }
 0x461   :  { %2417 = vmatprep.subr.bf16.mxu0 %v3039_v58  ;;  %2449 = vmatprep.subr.bf16.mxu1 %v3043_v61 }
 0x464   :  { %2419 = vmatpush1.bf16.msra.mxu0 %v3050_v2  ;;  %2451 = vmatpush1.bf16.msra.mxu1 %v3054_v5 }
 0x465   :  { %2421 = vmatprep.subr.bf16.mxu0 %v3058_v8  ;;  %2453 = vmatprep.subr.bf16.mxu1 %v3062_v11 }
 0x468   :  { %2423 = vmatpush1.bf16.msra.mxu0 %v3069_v15  ;;  %2455 = vmatpush1.bf16.msra.mxu1 %v3073_v19 }
 0x469   :  { %2425 = vmatprep.subr.bf16.mxu0 %v3077_v24  ;;  %2457 = vmatprep.subr.bf16.mxu1 %v3081_v28 }
 0x46c   :  { %2427 = vmatpush1.bf16.msra.mxu0 %v3088_v33  ;;  %2459 = vmatpush1.bf16.msra.mxu1 %v3092_v39 }
 0x46d   :  { %2429 = vmatprep.subr.bf16.mxu0 %v3096_v43  ;;  %2461 = vmatprep.subr.bf16.mxu1 %v3100_v46 }
 0x470   :  { %2431 = vmatpush1.bf16.msra.mxu0 %v3107_v52  ;;  %2463 = vmatpush1.bf16.msra.mxu1 %v3111_v56 }
 0x471   :  { %2433 = vmatprep.subr.bf16.mxu0 %v3115_v60  ;;  %2465 = vmatprep.subr.bf16.mxu1 %v3119_v1 }
 0x474   :  { %2435 = vmatpush1.bf16.msra.mxu0 %v3126_v4  ;;  %2467 = vmatpush1.bf16.msra.mxu1 %v3130_v6 }
 0x475   :  { %2469 = vmatprep.subr.bf16.mxu0 %v2992_v17  ;;  %2501 = vmatprep.subr.bf16.mxu1 %v2994_v21 }
 0x52a   :  { %v1226_v7 = vpop.f32.mrb[8].mxu0  ;;  %v1297_v9 = vpop.f32.mrb[8].mxu1 }
 0x52b   :  { %v2628_v10 = vadd.f32 %v1226_v7, %v3182_v14  ;;  %v1228_v20 = vpop.f32.mrb[9].mxu0  ;;  %v1299_v23 = vpop.f32.mrb[9].mxu1  ;;  %v2644_v31 = vadd.f32 %v1297_v9, %v3188_v36 }
 0x52c   :  { %v2629_v26 = vadd.f32 %v1228_v20, %v3184_v16  ;;  %v2645_v32 = vadd.f32 %v1299_v23, %v3191_v44 }
 0x52d   :  { %v2011_v27 = vmul.f32 -1.442695, %v2628_v10  ;;  %v2013_v37 = vmul.f32 -1.442695, %v2644_v31 }
 0x52e   :  { %v2012_v30 = vmul.f32 -1.442695, %v2629_v26 }
 0x52f   :  { %2758 = vpow2.f32 %v2011_v27 }
 0x530   :  { %2760 = vpow2.f32 %v2012_v30 }
 0x531   :  { %2762 = vtanh.f32 %v2645_v32 }
 0x532   :  { %2764 = vpow2.f32 %v2013_v37 }
 0x539   :  { %v2759_v40 = vpop.eup %2758 }
 0x53a   :  { %v1315_v41 = vadd.f32 1.0, %v2759_v40  ;;  %v2761_v45 = vpop.eup %2760 }
 0x53b   :  { %v1316_v48 = vadd.f32 1.0, %v2761_v45  ;;  %v2763_v49 = vpop.eup %2762 }
 0x53c   :  { %2766 = vrcp.f32 %v1315_v41  ;;  %v2765_v51 = vpop.eup %2764 }
 0x53d   :  { %2768 = vrcp.f32 %v1316_v48  ;;  %v1317_v59 = vadd.f32 1.0, %v2765_v51 }
 0x53f   :  { %2770 = vrcp.f32 %v1317_v59 }
 0x546   :  { %v2767_v53 = vpop.eup %2766 }
 0x547   :  { %v1326_v55 = vmul.f32 %v2767_v53, %v2763_v49  ;;  %v2769_v57 = vpop.eup %2768 }
 0x548   :  { %v1325_v62 = vmul.f32 %v2769_v57, %v3320_v3 }
 0x549   :  { %v2771_v12 = vpop.eup %2770 }
 0x54a   :  { %v3362_v63 = vadd.f32 %v1326_v55, %v1325_v62 }
 0x54c   :  { %2772 = vtanh.f32 %v3362_v63 }
 0x556   :  { %v2773_v13 = vpop.eup %2772 }
 0x557   :  { %v1329_v18 = vmul.f32 %v2773_v13, %v2771_v12  ;;  %v1869_v13 = vld [vmem:[#allocation8 + $0x18] sm:$0xff] }
 0x559   :  { %1402 = vmatmul.mubr.f32.vlgmr.msra.gmra.mrb[10].mxu0 %v1329_v18  ;;  %1473 = vmatmul.mubr.f32.vlgmr.msra.gmra.mrb[10].mxu1 %v1329_v18 }
 0x55a   :  { %2471 = vmatpush1.bf16.msra.mxu0 %v2996_v22  ;;  %2503 = vmatpush1.bf16.msra.mxu1 %v2999_v25 }
 0x55b   :  { %2473 = vmatprep.subr.bf16.mxu0 %v3003_v29  ;;  %2505 = vmatprep.subr.bf16.mxu1 %v3010_v34 }
 0x55c   :  { %1578 = vmatprep.mubr.f32.mxu0 %v2900_v0  ;;  %1649 = vmatprep.mubr.f32.mxu1 %v2900_v0 }
 0x55e   :  { %2475 = vmatpush1.bf16.msra.mxu0 %v3012_v35  ;;  %2507 = vmatpush1.bf16.msra.mxu1 %v3016_v38 }
 0x55f   :  { %2477 = vmatprep.subr.bf16.mxu0 %v3020_v42  ;;  %2509 = vmatprep.subr.bf16.mxu1 %v3027_v47 }
 0x562   :  { %2479 = vmatpush1.bf16.msra.mxu0 %v3031_v50  ;;  %2511 = vmatpush1.bf16.msra.mxu1 %v3035_v54 }
 0x563   :  { %2481 = vmatprep.subr.bf16.mxu0 %v3039_v58  ;;  %2513 = vmatprep.subr.bf16.mxu1 %v3043_v61 }
 0x566   :  { %2483 = vmatpush1.bf16.msra.mxu0 %v3050_v2  ;;  %2515 = vmatpush1.bf16.msra.mxu1 %v3054_v5 }
 0x567   :  { %2485 = vmatprep.subr.bf16.mxu0 %v3058_v8  ;;  %2517 = vmatprep.subr.bf16.mxu1 %v3062_v11 }
 0x56a   :  { %2487 = vmatpush1.bf16.msra.mxu0 %v3069_v15  ;;  %2519 = vmatpush1.bf16.msra.mxu1 %v3073_v19 }
 0x56b   :  { %2489 = vmatprep.subr.bf16.mxu0 %v3077_v24  ;;  %2521 = vmatprep.subr.bf16.mxu1 %v3081_v28 }
 0x56e   :  { %2491 = vmatpush1.bf16.msra.mxu0 %v3088_v33  ;;  %2523 = vmatpush1.bf16.msra.mxu1 %v3092_v39 }
 0x56f   :  { %2493 = vmatprep.subr.bf16.mxu0 %v3096_v43  ;;  %2525 = vmatprep.subr.bf16.mxu1 %v3100_v46 }
 0x572   :  { %2495 = vmatpush1.bf16.msra.mxu0 %v3107_v52  ;;  %2527 = vmatpush1.bf16.msra.mxu1 %v3111_v56 }
 0x573   :  { %2497 = vmatprep.subr.bf16.mxu0 %v3115_v60  ;;  %2529 = vmatprep.subr.bf16.mxu1 %v3119_v1 }
 0x576   :  { %2499 = vmatpush1.bf16.msra.mxu0 %v3126_v4  ;;  %2531 = vmatpush1.bf16.msra.mxu1 %v3130_v6 }
 0x577   :  { %2533 = vmatprep.subr.bf16.mxu0 %v2992_v17  ;;  %2565 = vmatprep.subr.bf16.mxu1 %v2994_v21 }
 0x62c   :  { %v1403_v3 = vpop.f32.mrb[10].mxu0  ;;  %v1474_v7 = vpop.f32.mrb[10].mxu1 }
 0x62d   :  { %v2630_v9 = vadd.f32 %v1403_v3, %v3182_v14  ;;  %v1405_v10 = vpop.f32.mrb[11].mxu0  ;;  %v1476_v20 = vpop.f32.mrb[11].mxu1  ;;  %v2646_v30 = vadd.f32 %v1474_v7, %v3188_v36  ;;  %v1870_v3 = vld [vmem:[#allocation8 + $0x20] sm:$0xff]  ;;  %v1871_v7 = vld [vmem:[#allocation8 + $0x28] sm:$0xff] }
 0x62e   :  { %v2631_v23 = vadd.f32 %v1405_v10, %v3184_v16  ;;  %v2647_v31 = vadd.f32 %v1476_v20, %v3191_v44  ;;  %v1872_v10 = vld [vmem:[#allocation8 + $0x30] sm:$0xff]  ;;  %v1873_v20 = vld [vmem:[#allocation8 + $0x38] sm:$0xff] }
 0x62f   :  { %v2014_v26 = vmul.f32 -1.442695, %v2630_v9  ;;  %v2016_v32 = vmul.f32 -1.442695, %v2646_v30  ;;  %v2603_v9 = vpack.c.bf16 %v1871_v7, %v1870_v3 }
 0x630   :  { %v2015_v27 = vmul.f32 -1.442695, %v2631_v23  ;;  %v2606_v23 = vpack.c.bf16 %v1873_v20, %v1872_v10 }
 0x631   :  { %2774 = vpow2.f32 %v2014_v26  ;;  %v1874_v26 = vld [vmem:[#allocation8 + $0x40] sm:$0xff] }
 0x632   :  { %2776 = vpow2.f32 %v2015_v27  ;;  %v1875_v27 = vld [vmem:[#allocation8 + $0x48] sm:$0xff] }
 0x633   :  { %2778 = vtanh.f32 %v2647_v31  ;;  %v2609_v30 = vpack.c.bf16 %v1875_v27, %v1874_v26  ;;  %v1876_v31 = vld [vmem:[#allocation8 + $0x50] sm:$0xff] }
 0x634   :  { %2780 = vpow2.f32 %v2016_v32  ;;  %v1877_v32 = vld [vmem:[#allocation8 + $0x58] sm:$0xff] }
 0x63b   :  { %v2775_v17 = vpop.eup %2774 }
 0x63c   :  { %v1492_v37 = vadd.f32 1.0, %v2775_v17  ;;  %v2777_v21 = vpop.eup %2776  ;;  %v2612_v17 = vpack.c.bf16 %v1877_v32, %v1876_v31 }
 0x63d   :  { %v1493_v40 = vadd.f32 1.0, %v2777_v21  ;;  %v2779_v41 = vpop.eup %2778  ;;  %v1879_v21 = vld [vmem:[#allocation8 + $0x68] sm:$0xff] }
 0x63e   :  { %2782 = vrcp.f32 %v1492_v37  ;;  %v2781_v45 = vpop.eup %2780  ;;  %v1878_v37 = vld [vmem:[#allocation8 + $0x60] sm:$0xff] }
 0x63f   :  { %2784 = vrcp.f32 %v1493_v40  ;;  %v1494_v53 = vadd.f32 1.0, %v2781_v45  ;;  %v2615_v40 = vpack.c.bf16 %v1879_v21, %v1878_v37  ;;  %v1881_v45 = vld [vmem:[#allocation8 + $0x78] sm:$0xff] }
 0x641   :  { %2786 = vrcp.f32 %v1494_v53 }
 0x648   :  { %v2783_v48 = vpop.eup %2782 }
 0x649   :  { %v1503_v49 = vmul.f32 %v2783_v48, %v2779_v41  ;;  %v2785_v51 = vpop.eup %2784  ;;  %v1880_v41 = vld [vmem:[#allocation8 + $0x70] sm:$0xff] }
 0x64a   :  { %v1502_v55 = vmul.f32 %v2785_v51, %v3362_v63  ;;  %v1868_v63 = vld [vmem:[#allocation8 + $0x10] sm:$0xff]  ;;  %v2618_v48 = vpack.c.bf16 %v1881_v45, %v1880_v41 }
 0x64b   :  { %v2787_v59 = vpop.eup %2786  ;;  %v2600_v18 = vpack.c.bf16 %v1869_v13, %v1868_v63 }
 0x64c   :  { %v3404_v57 = vadd.f32 %v1503_v49, %v1502_v55 }
 0x64e   :  { %2788 = vtanh.f32 %v3404_v57 }
 0x658   :  { %v2789_v62 = vpop.eup %2788 }
 0x659   :  { %v1506_v12 = vmul.f32 %v2789_v62, %v2787_v59 }
 0x65b   :  { %1579 = vmatmul.mubr.f32.vlgmr.msra.gmra.mrb[12].mxu0 %v1506_v12  ;;  %1650 = vmatmul.mubr.f32.vlgmr.msra.gmra.mrb[12].mxu1 %v1506_v12 }
 0x65c   :  { %2535 = vmatpush1.bf16.msra.mxu0 %v2996_v22  ;;  %2567 = vmatpush1.bf16.msra.mxu1 %v2999_v25 }
 0x65d   :  { %2537 = vmatprep.subr.bf16.mxu0 %v3003_v29  ;;  %2569 = vmatprep.subr.bf16.mxu1 %v3010_v34 }
 0x65e   :  { %1755 = vmatprep.mubr.f32.mxu0 %v2900_v0  ;;  %1826 = vmatprep.mubr.f32.mxu1 %v2900_v0 }
 0x660   :  { %2539 = vmatpush1.bf16.msra.mxu0 %v3012_v35  ;;  %2571 = vmatpush1.bf16.msra.mxu1 %v3016_v38 }
 0x661   :  { %2541 = vmatprep.subr.bf16.mxu0 %v3020_v42  ;;  %2573 = vmatprep.subr.bf16.mxu1 %v3027_v47 }
 0x664   :  { %2543 = vmatpush1.bf16.msra.mxu0 %v3031_v50  ;;  %2575 = vmatpush1.bf16.msra.mxu1 %v3035_v54 }
 0x665   :  { %2545 = vmatprep.subr.bf16.mxu0 %v3039_v58  ;;  %2577 = vmatprep.subr.bf16.mxu1 %v3043_v61 }
 0x668   :  { %2547 = vmatpush1.bf16.msra.mxu0 %v3050_v2  ;;  %2579 = vmatpush1.bf16.msra.mxu1 %v3054_v5 }
 0x669   :  { %2549 = vmatprep.subr.bf16.mxu0 %v3058_v8  ;;  %2581 = vmatprep.subr.bf16.mxu1 %v3062_v11 }
 0x66c   :  { %2551 = vmatpush1.bf16.msra.mxu0 %v3069_v15  ;;  %2583 = vmatpush1.bf16.msra.mxu1 %v3073_v19 }
 0x66d   :  { %2553 = vmatprep.subr.bf16.mxu0 %v3077_v24  ;;  %2585 = vmatprep.subr.bf16.mxu1 %v3081_v28 }
 0x670   :  { %2555 = vmatpush1.bf16.msra.mxu0 %v3088_v33  ;;  %2587 = vmatpush1.bf16.msra.mxu1 %v3092_v39 }
 0x671   :  { %2557 = vmatprep.subr.bf16.mxu0 %v3096_v43  ;;  %2589 = vmatprep.subr.bf16.mxu1 %v3100_v46 }
 0x674   :  { %2559 = vmatpush1.bf16.msra.mxu0 %v3107_v52  ;;  %2591 = vmatpush1.bf16.msra.mxu1 %v3111_v56 }
 0x675   :  { %2561 = vmatprep.subr.bf16.mxu0 %v3115_v60  ;;  %2593 = vmatprep.subr.bf16.mxu1 %v3119_v1  ;;  %v1866_v60 = vld [vmem:[#allocation8] sm:$0xff]  ;;  %v1867_v1 = vld [vmem:[#allocation8 + $0x8] sm:$0xff] }
 0x678   :  { %2563 = vmatpush1.bf16.msra.mxu0 %v3126_v4  ;;  %2595 = vmatpush1.bf16.msra.mxu1 %v3130_v6  ;;  %v2597_v4 = vpack.c.bf16 %v1867_v1, %v1866_v60  ;;  %v2901_v6 = vmov 0.0|0.0  }
 0x679   :  { %2596 = vmatprep.subr.bf16.mxu0 %v2901_v6 }
 0x72e   :  { %v1580_v22 = vpop.f32.mrb[12].mxu0  ;;  %v1651_v25 = vpop.f32.mrb[12].mxu1 }
 0x72f   :  { %v2632_v29 = vadd.f32 %v1580_v22, %v3182_v14  ;;  %v1582_v34 = vpop.f32.mrb[13].mxu0  ;;  %v1653_v35 = vpop.f32.mrb[13].mxu1  ;;  %v2648_v50 = vadd.f32 %v1651_v25, %v3188_v36 }
 0x730   :  { %v2633_v38 = vadd.f32 %v1582_v34, %v3184_v16  ;;  %v2649_v54 = vadd.f32 %v1653_v35, %v3191_v44 }
 0x731   :  { %v2017_v42 = vmul.f32 -1.442695, %v2632_v29  ;;  %v2019_v58 = vmul.f32 -1.442695, %v2648_v50 }
 0x732   :  { %v2018_v47 = vmul.f32 -1.442695, %v2633_v38 }
 0x733   :  { %2790 = vpow2.f32 %v2017_v42 }
 0x734   :  { %2792 = vpow2.f32 %v2018_v47 }
 0x735   :  { %2794 = vtanh.f32 %v2649_v54 }
 0x736   :  { %2796 = vpow2.f32 %v2019_v58 }
 0x73d   :  { %v2791_v61 = vpop.eup %2790 }
 0x73e   :  { %v1669_v2 = vadd.f32 1.0, %v2791_v61  ;;  %v2793_v5 = vpop.eup %2792 }
 0x73f   :  { %v1670_v8 = vadd.f32 1.0, %v2793_v5  ;;  %v2795_v11 = vpop.eup %2794  ;;  %v2023_v5 = vld [vmem:[%s3473_s5] ss:$0 sm:$0xff] }
 0x740   :  { %2798 = vrcp.f32 %v1669_v2  ;;  %v2797_v15 = vpop.eup %2796 }
 0x741   :  { %2800 = vrcp.f32 %v1670_v8  ;;  %v1671_v33 = vadd.f32 1.0, %v2797_v15 }
 0x743   :  { %2802 = vrcp.f32 %v1671_v33 }
 0x74a   :  { %v2799_v19 = vpop.eup %2798 }
 0x74b   :  { %v1680_v24 = vmul.f32 %v2799_v19, %v2795_v11  ;;  %v2801_v28 = vpop.eup %2800 }
 0x74c   :  { %v1679_v39 = vmul.f32 %v2801_v28, %v3404_v57 }
 0x74d   :  { %v2803_v46 = vpop.eup %2802 }
 0x74e   :  { %v3444_v43 = vadd.f32 %v1680_v24, %v1679_v39 }
 0x750   :  { %2804 = vtanh.f32 %v3444_v43 }
 0x75a   :  { %v2805_v52 = vpop.eup %2804 }
 0x75b   :  { %v1683_v56 = vmul.f32 %v2805_v52, %v2803_v46 }
 0x75d   :  { %1756 = vmatmul.mubr.f32.vlgmr.msra.gmra.mrb[14].mxu0 %v1683_v56  ;;  %1827 = vmatmul.mubr.f32.vlgmr.msra.gmra.mrb[14].mxu1 %v1683_v56 }
 0x75e   :  { %2598 = vmatpush3.bf16.msra.mxu0 %v2597_v4  ;;  %2073 = vmatprep.mubr.msk.f32.mxu0 %vm2902_vm1, %v2900_v0 }
 0x75f   :  { %2599 = vmatprep.subr.bf16.mxu0 %v2901_v6 }
 0x762   :  { %2601 = vmatpush3.bf16.msra.mxu0 %v2600_v18 }
 0x763   :  { %2602 = vmatprep.subr.bf16.mxu0 %v2901_v6 }
 0x766   :  { %2604 = vmatpush3.bf16.msra.mxu0 %v2603_v9 }
 0x767   :  { %2605 = vmatprep.subr.bf16.mxu0 %v2901_v6 }
 0x76a   :  { %2607 = vmatpush3.bf16.msra.mxu0 %v2606_v23 }
 0x76b   :  { %2608 = vmatprep.subr.bf16.mxu0 %v2901_v6 }
 0x76e   :  { %2610 = vmatpush3.bf16.msra.mxu0 %v2609_v30 }
 0x76f   :  { %2611 = vmatprep.subr.bf16.mxu0 %v2901_v6 }
 0x772   :  { %2613 = vmatpush3.bf16.msra.mxu0 %v2612_v17 }
 0x773   :  { %2614 = vmatprep.subr.bf16.mxu0 %v2901_v6 }
 0x776   :  { %2616 = vmatpush3.bf16.msra.mxu0 %v2615_v40 }
 0x777   :  { %2617 = vmatprep.subr.bf16.mxu0 %v2901_v6 }
 0x77a   :  { %2619 = vmatpush3.bf16.msra.mxu0 %v2618_v48 }
 0x830   :  { %v1757_v49 = vpop.f32.mrb[14].mxu0  ;;  %v1828_v51 = vpop.f32.mrb[14].mxu1 }
 0x831   :  { %v2634_v53 = vadd.f32 %v1757_v49, %v3182_v14  ;;  %v1759_v55 = vpop.f32.mrb[15].mxu0  ;;  %v1830_v57 = vpop.f32.mrb[15].mxu1  ;;  %v2650_v0 = vadd.f32 %v1828_v51, %v3188_v36 }
 0x832   :  { %v2635_v59 = vadd.f32 %v1759_v55, %v3184_v16  ;;  %v2651_v22 = vadd.f32 %v1830_v57, %v3191_v44 }
 0x833   :  { %v2020_v62 = vmul.f32 -1.442695, %v2634_v53  ;;  %v2022_v25 = vmul.f32 -1.442695, %v2650_v0 }
 0x834   :  { %v2021_v12 = vmul.f32 -1.442695, %v2635_v59 }
 0x835   :  { %2806 = vpow2.f32 %v2020_v62 }
 0x836   :  { %2808 = vpow2.f32 %v2021_v12 }
 0x837   :  { %2810 = vtanh.f32 %v2651_v22 }
 0x838   :  { %2812 = vpow2.f32 %v2022_v25 }
 0x83f   :  { %v2807_v29 = vpop.eup %2806 }
 0x840   :  { %v1846_v34 = vadd.f32 1.0, %v2807_v29  ;;  %v2809_v35 = vpop.eup %2808 }
 0x841   :  { %v1847_v14 = vadd.f32 1.0, %v2809_v35  ;;  %v2811_v38 = vpop.eup %2810 }
 0x842   :  { %2814 = vrcp.f32 %v1846_v34  ;;  %v2813_v42 = vpop.eup %2812 }
 0x843   :  { %2816 = vrcp.f32 %v1847_v14  ;;  %v1848_v54 = vadd.f32 1.0, %v2813_v42 }
 0x845   :  { %2818 = vrcp.f32 %v1848_v54 }
 0x84c   :  { %v2815_v16 = vpop.eup %2814 }
 0x84d   :  { %v1857_v47 = vmul.f32 %v2815_v16, %v2811_v38  ;;  %v2817_v50 = vpop.eup %2816 }
 0x84e   :  { %v1856_v58 = vmul.f32 %v2817_v50, %v3444_v43 }
 0x84f   :  { %v2819_v44 = vpop.eup %2818 }
 0x850   :  { %v1858_v36 = vadd.f32 %v1857_v47, %v1856_v58 }
 0x852   :  { %2820 = vtanh.f32 %v1858_v36 }
 0x85c   :  { %v2821_v61 = vpop.eup %2820 }
 0x85d   :  { %v1860_v2 = vmul.f32 %v2821_v61, %v2819_v44 }
 0x85f   :  { %2074 = vmatmul.mubr.f32.vlgmr.msra.gmra.mrb[16].mxu0 %v1860_v2 }
 0x932   :  { %v1955_v8 = vpop.f32.mrb[16].mxu0 }
 0x933   :  { %v1956_v11 = vadd.f32 %v2023_v5, %v1955_v8  ;;  %v2075_v15 = vpop.f32.mrb[17].mxu0 }
 0x935   :  { %1959 = vst [vmem:[#allocation10] sm:$0xff] %v1956_v11 }
 0x936   :  { %2877 = shalt.err (!%p2874_p6)
}
 0x937   :  { %s2878_s11 = scalar_lea.hbm %s3474_s6, 128 }
 0x938   :  { %p2879_p7 = scmp.ne.s32.totalorder %s3474_s6, %s2878_s11  ;;  %p2882_p8 = scmp.lt.u32.totalorder %s2878_s11, %s3474_s6 }
 0x93a   :  { %p2884_p9 = pnand %p2882_p8, %p2879_p7 }
 0x93c   :  { %2887 = shalt.err (!%p2884_p9)
}
 0x93d   :  { %1969 = dma.vmem_to_hbm [thread:$0]  %s1967_s7, 128, %s3474_s6, [#allocation7]  }
 0x93e   :  { %2892 = dma.done.wait [#allocation7], 128  }
 0x93f   :  { %2893 = vsyncadd [#allocation7], 4294967168 }
 0x940   :  { %1973 = vsyncpa [#allocation6], 1 }
 0x941   :  { %1974 = vsyncpa [#allocation9], 1 }
 0x942   :  { %1975 = vsyncpa [#allocation7], 1 }

</bundles_post_ra>
